<compile_context>
chip_gen: v7x
topology: tpu7x:2x2x1
jax: 0.10.0
libtpu: 0.0.40
codegen_flags: <defaults>
</compile_context>

<pallas_src>
import functools

import numpy as np

import jax
import jax.numpy as jnp
from jax.experimental import pallas as pl
from jax.experimental.pallas import tpu as pltpu


# ----------------------------------------------------------------------------
# Fused kernel: input projection + LSTM recurrence + MDN heads, one invocation.
#
#   x_ref    : (T*B, D)   bf16, time-major rows (row = t*B + b)
#   w_ih_ref : (D, 4H)    bf16
#   w_hh_ref : (H, 4H)    bf16
#   b_ref    : (1, 4H)    f32   (b_ih + b_hh, PyTorch gate order [i,f,g,o])
#   w_hd_ref : (H, P)     bf16  fused head weights, 128-aligned regions
#   b_hd_ref : (1, P)     f32
#   smx_ref  : (GLP, GLP) f32   block-diagonal group-sum matrix for pi softmax
#   slab_ref : (T*B, P)   f32   out: [softmax(pi)|mu|exp(sig)|reward,done,pad]
#   hN_ref   : (B, H)     f32   out: final hidden state
#   cN_ref   : (B, H)     f32   out: final cell state
#   gx_ref   : (T*B, 4H)  f32   scratch: precomputed x @ W_ih + b
#   y_ref    : (T*B, H)   f32   scratch: LSTM outputs for the heads matmul
# ----------------------------------------------------------------------------
def _mdnrnn_fused_kernel(x_ref, w_ih_ref, w_hh_ref, b_ref, w_hd_ref, b_hd_ref,
                         smx_ref, slab_ref, hN_ref, cN_ref, gx_ref, y_ref):
    TB, _ = x_ref.shape
    H = w_hh_ref.shape[0]
    B = hN_ref.shape[0]
    T = TB // B
    GLP = smx_ref.shape[0]

    # -- input projection for ALL timesteps (one MXU matmul, bias folded) ----
    gx_ref[...] = (jnp.dot(x_ref[...], w_ih_ref[...],
                           preferred_element_type=jnp.float32)
                   + b_ref[...])

    w_hh = w_hh_ref[...]                     # (H, 4H) bf16, loaded once

    def step(t, h_prev, c_prev):
        # Only h_prev @ W_hh is on the serial critical path.
        gates = gx_ref[pl.ds(t * B, B), :] + jnp.dot(
            h_prev.astype(jnp.bfloat16), w_hh,
            preferred_element_type=jnp.float32)         # (B, 4H) f32
        # Full-width sigmoid (3 of 4 gates use it), tanh only on the g slice.
        # NOTE: with H < 128 the gate slices sit at unaligned lane offsets
        # (XLU rotates); acceptable here, revisit layout if H stays small.
        sg = jax.nn.sigmoid(gates)
        g = jnp.tanh(gates[:, 2 * H:3 * H])
        i = sg[:, 0 * H:1 * H]
        f = sg[:, 1 * H:2 * H]
        o = sg[:, 3 * H:4 * H]
        c = f * c_prev + i * g
        h = o * jnp.tanh(c)
        y_ref[pl.ds(t * B, B), :] = h                    # VMEM-resident y
        return h, c

    h = jnp.zeros((B, H), jnp.float32)
    c = jnp.zeros((B, H), jnp.float32)
    if T <= 16:
        # Full unroll with static slice offsets (demo path).
        for t in range(T):
            h, c = step(t, h, c)
    else:
        # Partial unroll so the LLO scheduler overlaps step t+1's MXU push
        # with step t's elementwise/EUP epilogue.
        def body(t, carry):
            return step(t, *carry)
        h, c = jax.lax.fori_loop(0, T, body, (h, c), unroll=8)

    hN_ref[...] = h                                      # written once
    cN_ref[...] = c

    # -- fused MDN heads: one (T*B,H)@(H,P) matmul + per-region activations --
    z = (jnp.dot(y_ref[...].astype(jnp.bfloat16), w_hd_ref[...],
                 preferred_element_type=jnp.float32)
         + b_hd_ref[...])                                # (T*B, P) f32

    # pi: grouped softmax over the latent dim within each gaussian.  A single
    # per-row max is a valid shift for every group; per-group denominators via
    # one block-diagonal ones matmul (padding columns map to themselves).
    zp = z[:, 0:GLP]
    zp = zp - jnp.max(zp, axis=-1, keepdims=True)
    e = jnp.exp(zp)
    denom = jnp.dot(e, smx_ref[...], preferred_element_type=jnp.float32)
    slab_ref[:, 0:GLP] = e * pl.reciprocal(denom, approx=True)

    slab_ref[:, GLP:2 * GLP] = z[:, GLP:2 * GLP]                  # mu
    slab_ref[:, 2 * GLP:3 * GLP] = jnp.exp(z[:, 2 * GLP:3 * GLP])  # sigma

    # Tail region = [reward | done | zero padding]; sigmoid only on the done
    # lane, reward left linear.  One full-width (128-lane) aligned store.
    tail = z[:, 3 * GLP:]
    col = jax.lax.broadcasted_iota(jnp.int32, tail.shape, 1)
    slab_ref[:, 3 * GLP:] = jnp.where(col == 1, jax.nn.sigmoid(tail), tail)


# ----------------------------------------------------------------------------
# Parameter construction (PyTorch-like uniform init) and packing.
# ----------------------------------------------------------------------------
def init_params(key, action_size, latent_size, hidden_size, n_gaussians):
    D = action_size + latent_size
    H = hidden_size
    GL = n_gaussians * latent_size
    bound = H ** -0.5
    ks = jax.random.split(key, 14)

    def u(k, shape):
        return jax.random.uniform(k, shape, jnp.float32, -bound, bound)

    return {
        # LSTM (stored transposed to (in, 4H) for x @ W; gate order [i,f,g,o])
        "w_ih": u(ks[0], (D, 4 * H)),
        "w_hh": u(ks[1], (H, 4 * H)),
        "b":    u(ks[2], (1, 4 * H)) + u(ks[3], (1, 4 * H)),   # b_ih + b_hh
        # heads, (H, out) layout
        "w_pi": u(ks[4], (H, GL)),  "b_pi": u(ks[5], (1, GL)),
        "w_mu": u(ks[6], (H, GL)),  "b_mu": u(ks[7], (1, GL)),
        "w_sig": u(ks[8], (H, GL)), "b_sig": u(ks[9], (1, GL)),
        "w_r": u(ks[10], (H, 1)),   "b_r": u(ks[11], (1, 1)),
        "w_d": u(ks[12], (H, 1)),   "b_d": u(ks[13], (1, 1)),
    }


def pack_params(params, n_gaussians, latent_size):
    """One-time packing: fused, 128-lane-aligned head weights (bf16 for the
    MXU), bf16 LSTM weights, and the block-diagonal softmax-sum matrix."""
    H = params["w_hh"].shape[0]
    G, L = n_gaussians, latent_size
    GL = G * L
    GLP = ((GL + 127) // 128) * 128          # 128-aligned region width
    P = 3 * GLP + 128                        # pi | mu | sigma | tail(reward,done)

    w_hd = jnp.zeros((H, P), jnp.float32)
    b_hd = jnp.zeros((1, P), jnp.float32)
    for wname, bname, off in (("w_pi", "b_pi", 0),
                              ("w_mu", "b_mu", GLP),
                              ("w_sig", "b_sig", 2 * GLP)):
        w_hd = w_hd.at[:, off:off + GL].set(params[wname])
        b_hd = b_hd.at[:, off:off + GL].set(params[bname])
    w_hd = w_hd.at[:, 3 * GLP:3 * GLP + 1].set(params["w_r"])
    w_hd = w_hd.at[:, 3 * GLP + 1:3 * GLP + 2].set(params["w_d"])
    b_hd = b_hd.at[:, 3 * GLP:3 * GLP + 1].set(params["b_r"])
    b_hd = b_hd.at[:, 3 * GLP + 1:3 * GLP + 2].set(params["b_d"])

    # Block-diagonal group-sum matrix: real columns sum within their gaussian
    # group of L; padded columns map to themselves (pi_pad -> 1, sliced off).
    smx = np.zeros((GLP, GLP), np.float32)
    for g in range(G):
        smx[g * L:(g + 1) * L, g * L:(g + 1) * L] = 1.0
    for cpad in range(GL, GLP):
        smx[cpad, cpad] = 1.0

    return {
        "w_ih": params["w_ih"].astype(jnp.bfloat16),
        "w_hh": params["w_hh"].astype(jnp.bfloat16),
        "b": params["b"].astype(jnp.float32),
        "w_hd": w_hd.astype(jnp.bfloat16),
        "b_hd": b_hd,
        "smx": jnp.asarray(smx),
    }


# ----------------------------------------------------------------------------
# Forward wrapper (mirrors MModel.forward; hidden_state=None path).
# ----------------------------------------------------------------------------
@functools.partial(jax.jit, static_argnames=("n_gaussians", "latent_size"))
def mmodel_forward(latent_vector, action, packed, *, n_gaussians, latent_size):
    B, T, _ = latent_vector.shape
    H = packed["w_hh"].shape[0]
    GL = n_gaussians * latent_size
    GLP = packed["smx"].shape[0]
    P = packed["w_hd"].shape[1]

    # Time-major 2D input rows (row = t*B + b).  concat + transpose + bf16
    # cast fuse into one tiny XLA copy feeding the kernel; the projection
    # itself happens inside the kernel (no gates_x HBM round-trip).
    x = jnp.concatenate([latent_vector, action], axis=-1)            # (B,T,D)
    x_tm = jnp.transpose(x, (1, 0, 2)).reshape(T * B, -1).astype(jnp.bfloat16)

    slab, h_n, c_n = pl.pallas_call(
        _mdnrnn_fused_kernel,
        out_shape=(
            jax.ShapeDtypeStruct((T * B, P), jnp.float32),
            jax.ShapeDtypeStruct((B, H), jnp.float32),
            jax.ShapeDtypeStruct((B, H), jnp.float32),
        ),
        scratch_shapes=[
            pltpu.VMEM((T * B, 4 * H), jnp.float32),   # gx: x @ W_ih + b
            pltpu.VMEM((T * B, H), jnp.float32),       # y : LSTM outputs
        ],
    )(x_tm, packed["w_ih"], packed["w_hh"], packed["b"],
      packed["w_hd"], packed["b_hd"], packed["smx"])

    # Unpack the lane-dense slab (single post-kernel XLA fusion).
    slab = slab.reshape(T, B, P).transpose(1, 0, 2)                  # (B,T,P)
    pi = slab[:, :, 0:GL].reshape(B, T, n_gaussians, latent_size)
    mu = slab[:, :, GLP:GLP + GL].reshape(B, T, n_gaussians, latent_size)
    sigma = slab[:, :, 2 * GLP:2 * GLP + GL].reshape(
        B, T, n_gaussians, latent_size)
    rs = slab[:, :, 3 * GLP]
    ds = slab[:, :, 3 * GLP + 1]
    # PyTorch returns hidden as (num_layers=1, B, H)
    return (pi, mu, sigma, rs, ds), (h_n[None, :, :], c_n[None, :, :])


# ----------------------------------------------------------------------------
# Pure-JAX f32 reference (for a loose numerical self-check of the kernel).
# ----------------------------------------------------------------------------
def mmodel_reference(latent_vector, action, params, n_gaussians, latent_size):
    x = jnp.concatenate([latent_vector, action], axis=-1)            # (B,T,D)
    B, T, _ = x.shape
    H = params["w_hh"].shape[0]
    G, L = n_gaussians, latent_size

    def step(carry, x_t):
        h, c = carry
        gates = x_t @ params["w_ih"] + h @ params["w_hh"] + params["b"][0]
        i = jax.nn.sigmoid(gates[:, 0 * H:1 * H])
        f = jax.nn.sigmoid(gates[:, 1 * H:2 * H])
        g = jnp.tanh(gates[:, 2 * H:3 * H])
        o = jax.nn.sigmoid(gates[:, 3 * H:4 * H])
        c = f * c + i * g
        h = o * jnp.tanh(c)
        return (h, c), h

    zeros = jnp.zeros((B, H), jnp.float32)
    (h_n, c_n), ys = jax.lax.scan(step, (zeros, zeros),
                                  jnp.transpose(x, (1, 0, 2)))
    y = jnp.transpose(ys, (1, 0, 2))                                 # (B,T,H)

    def lin(w, b):
        return y @ w + b[0]

    pi = jax.nn.softmax(lin(params["w_pi"], params["b_pi"])
                        .reshape(B, T, G, L), axis=-1)
    mu = lin(params["w_mu"], params["b_mu"]).reshape(B, T, G, L)
    sigma = jnp.exp(lin(params["w_sig"], params["b_sig"]).reshape(B, T, G, L))
    rs = lin(params["w_r"], params["b_r"])[..., 0]
    ds = jax.nn.sigmoid(lin(params["w_d"], params["b_d"]))[..., 0]
    return (pi, mu, sigma, rs, ds), (h_n[None], c_n[None])


if __name__ == "__main__":
    B, T = 2, 8
    action_size = 4
    latent_size = 32
    hidden_size = 32
    n_gaussians = 5

    key = jax.random.PRNGKey(0)
    k_lat, k_act, k_par = jax.random.split(key, 3)
    latent_vector = jax.random.normal(k_lat, (B, T, latent_size), jnp.float32)
    action = jax.random.normal(k_act, (B, T, action_size), jnp.float32)
    params = init_params(k_par, action_size, latent_size, hidden_size,
                         n_gaussians)
    packed = pack_params(params, n_gaussians, latent_size)

    (pi, mu, sigma, rs, ds), (h_n, c_n) = mmodel_forward(
        latent_vector, action, packed,
        n_gaussians=n_gaussians, latent_size=latent_size)
    jax.block_until_ready((pi, mu, sigma, rs, ds, h_n, c_n))

    # Shape checks (mirror the PyTorch module's outputs).
    assert pi.shape == (B, T, n_gaussians, latent_size)
    assert mu.shape == (B, T, n_gaussians, latent_size)
    assert sigma.shape == (B, T, n_gaussians, latent_size)
    assert rs.shape == (B, T) and ds.shape == (B, T)
    assert h_n.shape == (1, B, hidden_size) and c_n.shape == (1, B, hidden_size)

    # Loose numerical check vs. a pure-JAX f32 reference (tolerance covers
    # bf16 MXU operands + the approximate reciprocal in the pi softmax).
    (pi_r, mu_r, sg_r, rs_r, ds_r), (h_r, c_r) = mmodel_reference(
        latent_vector, action, params, n_gaussians, latent_size)
    tol = 5e-2
    for got, ref, name in ((pi, pi_r, "pi"), (mu, mu_r, "mu"),
                           (sigma, sg_r, "sigma"), (rs, rs_r, "rs"),
                           (ds, ds_r, "ds"), (h_n, h_r, "h_n"),
                           (c_n, c_r, "c_n")):
        err = float(jnp.max(jnp.abs(got - ref)))
        assert err < tol, f"{name} mismatch: max abs err {err}"

    print("KERNEL_OK")
</pallas_src>

<mosaic_0001>
module attributes {stable_mosaic.version = 11 : i64} {
  func.func @_mdnrnn_fused_kernel(%arg0: memref<16x36xbf16, #tpu.memory_space<vmem>>, %arg1: memref<36x128xbf16, #tpu.memory_space<vmem>>, %arg2: memref<32x128xbf16, #tpu.memory_space<vmem>>, %arg3: memref<1x128xf32, #tpu.memory_space<vmem>>, %arg4: memref<32x896xbf16, #tpu.memory_space<vmem>>, %arg5: memref<1x896xf32, #tpu.memory_space<vmem>>, %arg6: memref<256x256xf32, #tpu.memory_space<vmem>>, %arg7: memref<16x896xf32, #tpu.memory_space<vmem>>, %arg8: memref<2x32xf32, #tpu.memory_space<vmem>>, %arg9: memref<2x32xf32, #tpu.memory_space<vmem>>, %arg10: memref<16x128xf32, #tpu.memory_space<vmem>>, %arg11: memref<16x32xf32, #tpu.memory_space<vmem>>) attributes {dimension_semantics = [], scalar_prefetch = 0 : i64, scratch_operands = 2 : i64, tpu.core_type = #tpu.core_type<tc>} {
    %c0 = arith.constant 0 : index
    %c0_0 = arith.constant 0 : index
    %0 = vector.load %arg0[%c0, %c0_0] : memref<16x36xbf16, #tpu.memory_space<vmem>>, vector<16x36xbf16>
    %c0_1 = arith.constant 0 : index
    %c0_2 = arith.constant 0 : index
    %1 = vector.load %arg1[%c0_1, %c0_2] : memref<36x128xbf16, #tpu.memory_space<vmem>>, vector<36x128xbf16>
    %cst = arith.constant dense<0.000000e+00> : vector<16x128xf32>
    %2 = tpu.matmul %0, %1, %cst {dimension_numbers = #tpu.dot_dimension_numbers<[1], [0], [0], [1], [0, 0, 1, 1], [], []>} : vector<16x36xbf16>, vector<36x128xbf16>, vector<16x128xf32> -> vector<16x128xf32>
    %c0_3 = arith.constant 0 : index
    %c0_4 = arith.constant 0 : index
    %3 = vector.load %arg3[%c0_3, %c0_4] : memref<1x128xf32, #tpu.memory_space<vmem>>, vector<1x128xf32>
    %4 = vector.broadcast %3 : vector<1x128xf32> to vector<16x128xf32>
    %5 = arith.addf %2, %4 : vector<16x128xf32>
    %c0_5 = arith.constant 0 : index
    %c0_6 = arith.constant 0 : index
    %6 = vector.load %arg10[%c0_5, %c0_6] : memref<16x128xf32, #tpu.memory_space<vmem>>, vector<16x128xf32>
    tpu.vector_store %arg10[%c0_5, %c0_6], %5 {strides = array<i32>} : memref<16x128xf32, #tpu.memory_space<vmem>>, vector<16x128xf32>,
    %c0_7 = arith.constant 0 : index
    %c0_8 = arith.constant 0 : index
    %7 = vector.load %arg2[%c0_7, %c0_8] : memref<32x128xbf16, #tpu.memory_space<vmem>>, vector<32x128xbf16>
    %cst_9 = arith.constant 0.000000e+00 : f32
    %8 = vector.broadcast %cst_9 : f32 to vector<2x32xf32>
    %cst_10 = arith.constant 0.000000e+00 : f32
    %9 = vector.broadcast %cst_10 : f32 to vector<2x32xf32>
    %c0_11 = arith.constant 0 : index
    %c0_12 = arith.constant 0 : index
    %10 = vector.load %arg10[%c0_11, %c0_12] : memref<16x128xf32, #tpu.memory_space<vmem>>, vector<2x128xf32>
    %11 = arith.truncf %8 : vector<2x32xf32> to vector<2x32xbf16>
    %cst_13 = arith.constant dense<0.000000e+00> : vector<2x128xf32>
    %12 = tpu.matmul %11, %7, %cst_13 {dimension_numbers = #tpu.dot_dimension_numbers<[1], [0], [0], [1], [0, 0, 1, 1], [], []>} : vector<2x32xbf16>, vector<32x128xbf16>, vector<2x128xf32> -> vector<2x128xf32>
    %13 = arith.addf %10, %12 : vector<2x128xf32>
    %14 = arith.negf %13 : vector<2x128xf32>
    %15 = math.exp %14 : vector<2x128xf32>
    %cst_14 = arith.constant 1.000000e+00 : f32
    %16 = vector.broadcast %cst_14 : f32 to vector<2x128xf32>
    %17 = arith.addf %16, %15 : vector<2x128xf32>
    %18 = arith.divf %16, %17 : vector<2x128xf32>
    %19 = vector.extract_strided_slice %13 {offsets = [0, 64], sizes = [2, 32], strides = [1, 1]} : vector<2x128xf32> to vector<2x32xf32>
    %20 = math.tanh %19 : vector<2x32xf32>
    %21 = vector.extract_strided_slice %18 {offsets = [0, 0], sizes = [2, 32], strides = [1, 1]} : vector<2x128xf32> to vector<2x32xf32>
    %22 = vector.extract_strided_slice %18 {offsets = [0, 32], sizes = [2, 32], strides = [1, 1]} : vector<2x128xf32> to vector<2x32xf32>
    %23 = vector.extract_strided_slice %18 {offsets = [0, 96], sizes = [2, 32], strides = [1, 1]} : vector<2x128xf32> to vector<2x32xf32>
    %24 = arith.mulf %22, %9 : vector<2x32xf32>
    %25 = arith.mulf %21, %20 : vector<2x32xf32>
    %26 = arith.addf %24, %25 : vector<2x32xf32>
    %27 = math.tanh %26 : vector<2x32xf32>
    %28 = arith.mulf %23, %27 : vector<2x32xf32>
    %c0_15 = arith.constant 0 : index
    %c0_16 = arith.constant 0 : index
    %29 = vector.load %arg11[%c0_15, %c0_16] : memref<16x32xf32, #tpu.memory_space<vmem>>, vector<2x32xf32>
    tpu.vector_store %arg11[%c0_15, %c0_16], %28 {strides = array<i32>} : memref<16x32xf32, #tpu.memory_space<vmem>>, vector<2x32xf32>,
    %c2 = arith.constant 2 : index
    %c0_17 = arith.constant 0 : index
    %30 = vector.load %arg10[%c2, %c0_17] : memref<16x128xf32, #tpu.memory_space<vmem>>, vector<2x128xf32>
    %31 = arith.truncf %28 : vector<2x32xf32> to vector<2x32xbf16>
    %cst_18 = arith.constant dense<0.000000e+00> : vector<2x128xf32>
    %32 = tpu.matmul %31, %7, %cst_18 {dimension_numbers = #tpu.dot_dimension_numbers<[1], [0], [0], [1], [0, 0, 1, 1], [], []>} : vector<2x32xbf16>, vector<32x128xbf16>, vector<2x128xf32> -> vector<2x128xf32>
    %33 = arith.addf %30, %32 : vector<2x128xf32>
    %34 = arith.negf %33 : vector<2x128xf32>
    %35 = math.exp %34 : vector<2x128xf32>
    %cst_19 = arith.constant 1.000000e+00 : f32
    %36 = vector.broadcast %cst_19 : f32 to vector<2x128xf32>
    %37 = arith.addf %36, %35 : vector<2x128xf32>
    %38 = arith.divf %36, %37 : vector<2x128xf32>
    %39 = vector.extract_strided_slice %33 {offsets = [0, 64], sizes = [2, 32], strides = [1, 1]} : vector<2x128xf32> to vector<2x32xf32>
    %40 = math.tanh %39 : vector<2x32xf32>
    %41 = vector.extract_strided_slice %38 {offsets = [0, 0], sizes = [2, 32], strides = [1, 1]} : vector<2x128xf32> to vector<2x32xf32>
    %42 = vector.extract_strided_slice %38 {offsets = [0, 32], sizes = [2, 32], strides = [1, 1]} : vector<2x128xf32> to vector<2x32xf32>
    %43 = vector.extract_strided_slice %38 {offsets = [0, 96], sizes = [2, 32], strides = [1, 1]} : vector<2x128xf32> to vector<2x32xf32>
    %44 = arith.mulf %42, %26 : vector<2x32xf32>
    %45 = arith.mulf %41, %40 : vector<2x32xf32>
    %46 = arith.addf %44, %45 : vector<2x32xf32>
    %47 = math.tanh %46 : vector<2x32xf32>
    %48 = arith.mulf %43, %47 : vector<2x32xf32>
    %c2_20 = arith.constant 2 : index
    %c0_21 = arith.constant 0 : index
    %49 = vector.load %arg11[%c2_20, %c0_21] : memref<16x32xf32, #tpu.memory_space<vmem>>, vector<2x32xf32>
    tpu.vector_store %arg11[%c2_20, %c0_21], %48 {strides = array<i32>} : memref<16x32xf32, #tpu.memory_space<vmem>>, vector<2x32xf32>,
    %c4 = arith.constant 4 : index
    %c0_22 = arith.constant 0 : index
    %50 = vector.load %arg10[%c4, %c0_22] : memref<16x128xf32, #tpu.memory_space<vmem>>, vector<2x128xf32>
    %51 = arith.truncf %48 : vector<2x32xf32> to vector<2x32xbf16>
    %cst_23 = arith.constant dense<0.000000e+00> : vector<2x128xf32>
    %52 = tpu.matmul %51, %7, %cst_23 {dimension_numbers = #tpu.dot_dimension_numbers<[1], [0], [0], [1], [0, 0, 1, 1], [], []>} : vector<2x32xbf16>, vector<32x128xbf16>, vector<2x128xf32> -> vector<2x128xf32>
    %53 = arith.addf %50, %52 : vector<2x128xf32>
    %54 = arith.negf %53 : vector<2x128xf32>
    %55 = math.exp %54 : vector<2x128xf32>
    %cst_24 = arith.constant 1.000000e+00 : f32
    %56 = vector.broadcast %cst_24 : f32 to vector<2x128xf32>
    %57 = arith.addf %56, %55 : vector<2x128xf32>
    %58 = arith.divf %56, %57 : vector<2x128xf32>
    %59 = vector.extract_strided_slice %53 {offsets = [0, 64], sizes = [2, 32], strides = [1, 1]} : vector<2x128xf32> to vector<2x32xf32>
    %60 = math.tanh %59 : vector<2x32xf32>
    %61 = vector.extract_strided_slice %58 {offsets = [0, 0], sizes = [2, 32], strides = [1, 1]} : vector<2x128xf32> to vector<2x32xf32>
    %62 = vector.extract_strided_slice %58 {offsets = [0, 32], sizes = [2, 32], strides = [1, 1]} : vector<2x128xf32> to vector<2x32xf32>
    %63 = vector.extract_strided_slice %58 {offsets = [0, 96], sizes = [2, 32], strides = [1, 1]} : vector<2x128xf32> to vector<2x32xf32>
    %64 = arith.mulf %62, %46 : vector<2x32xf32>
    %65 = arith.mulf %61, %60 : vector<2x32xf32>
    %66 = arith.addf %64, %65 : vector<2x32xf32>
    %67 = math.tanh %66 : vector<2x32xf32>
    %68 = arith.mulf %63, %67 : vector<2x32xf32>
    %c4_25 = arith.constant 4 : index
    %c0_26 = arith.constant 0 : index
    %69 = vector.load %arg11[%c4_25, %c0_26] : memref<16x32xf32, #tpu.memory_space<vmem>>, vector<2x32xf32>
    tpu.vector_store %arg11[%c4_25, %c0_26], %68 {strides = array<i32>} : memref<16x32xf32, #tpu.memory_space<vmem>>, vector<2x32xf32>,
    %c6 = arith.constant 6 : index
    %c0_27 = arith.constant 0 : index
    %70 = vector.load %arg10[%c6, %c0_27] : memref<16x128xf32, #tpu.memory_space<vmem>>, vector<2x128xf32>
    %71 = arith.truncf %68 : vector<2x32xf32> to vector<2x32xbf16>
    %cst_28 = arith.constant dense<0.000000e+00> : vector<2x128xf32>
    %72 = tpu.matmul %71, %7, %cst_28 {dimension_numbers = #tpu.dot_dimension_numbers<[1], [0], [0], [1], [0, 0, 1, 1], [], []>} : vector<2x32xbf16>, vector<32x128xbf16>, vector<2x128xf32> -> vector<2x128xf32>
    %73 = arith.addf %70, %72 : vector<2x128xf32>
    %74 = arith.negf %73 : vector<2x128xf32>
    %75 = math.exp %74 : vector<2x128xf32>
    %cst_29 = arith.constant 1.000000e+00 : f32
    %76 = vector.broadcast %cst_29 : f32 to vector<2x128xf32>
    %77 = arith.addf %76, %75 : vector<2x128xf32>
    %78 = arith.divf %76, %77 : vector<2x128xf32>
    %79 = vector.extract_strided_slice %73 {offsets = [0, 64], sizes = [2, 32], strides = [1, 1]} : vector<2x128xf32> to vector<2x32xf32>
    %80 = math.tanh %79 : vector<2x32xf32>
    %81 = vector.extract_strided_slice %78 {offsets = [0, 0], sizes = [2, 32], strides = [1, 1]} : vector<2x128xf32> to vector<2x32xf32>
    %82 = vector.extract_strided_slice %78 {offsets = [0, 32], sizes = [2, 32], strides = [1, 1]} : vector<2x128xf32> to vector<2x32xf32>
    %83 = vector.extract_strided_slice %78 {offsets = [0, 96], sizes = [2, 32], strides = [1, 1]} : vector<2x128xf32> to vector<2x32xf32>
    %84 = arith.mulf %82, %66 : vector<2x32xf32>
    %85 = arith.mulf %81, %80 : vector<2x32xf32>
    %86 = arith.addf %84, %85 : vector<2x32xf32>
    %87 = math.tanh %86 : vector<2x32xf32>
    %88 = arith.mulf %83, %87 : vector<2x32xf32>
    %c6_30 = arith.constant 6 : index
    %c0_31 = arith.constant 0 : index
    %89 = vector.load %arg11[%c6_30, %c0_31] : memref<16x32xf32, #tpu.memory_space<vmem>>, vector<2x32xf32>
    tpu.vector_store %arg11[%c6_30, %c0_31], %88 {strides = array<i32>} : memref<16x32xf32, #tpu.memory_space<vmem>>, vector<2x32xf32>,
    %c8 = arith.constant 8 : index
    %c0_32 = arith.constant 0 : index
    %90 = vector.load %arg10[%c8, %c0_32] : memref<16x128xf32, #tpu.memory_space<vmem>>, vector<2x128xf32>
    %91 = arith.truncf %88 : vector<2x32xf32> to vector<2x32xbf16>
    %cst_33 = arith.constant dense<0.000000e+00> : vector<2x128xf32>
    %92 = tpu.matmul %91, %7, %cst_33 {dimension_numbers = #tpu.dot_dimension_numbers<[1], [0], [0], [1], [0, 0, 1, 1], [], []>} : vector<2x32xbf16>, vector<32x128xbf16>, vector<2x128xf32> -> vector<2x128xf32>
    %93 = arith.addf %90, %92 : vector<2x128xf32>
    %94 = arith.negf %93 : vector<2x128xf32>
    %95 = math.exp %94 : vector<2x128xf32>
    %cst_34 = arith.constant 1.000000e+00 : f32
    %96 = vector.broadcast %cst_34 : f32 to vector<2x128xf32>
    %97 = arith.addf %96, %95 : vector<2x128xf32>
    %98 = arith.divf %96, %97 : vector<2x128xf32>
    %99 = vector.extract_strided_slice %93 {offsets = [0, 64], sizes = [2, 32], strides = [1, 1]} : vector<2x128xf32> to vector<2x32xf32>
    %100 = math.tanh %99 : vector<2x32xf32>
    %101 = vector.extract_strided_slice %98 {offsets = [0, 0], sizes = [2, 32], strides = [1, 1]} : vector<2x128xf32> to vector<2x32xf32>
    %102 = vector.extract_strided_slice %98 {offsets = [0, 32], sizes = [2, 32], strides = [1, 1]} : vector<2x128xf32> to vector<2x32xf32>
    %103 = vector.extract_strided_slice %98 {offsets = [0, 96], sizes = [2, 32], strides = [1, 1]} : vector<2x128xf32> to vector<2x32xf32>
    %104 = arith.mulf %102, %86 : vector<2x32xf32>
    %105 = arith.mulf %101, %100 : vector<2x32xf32>
    %106 = arith.addf %104, %105 : vector<2x32xf32>
    %107 = math.tanh %106 : vector<2x32xf32>
    %108 = arith.mulf %103, %107 : vector<2x32xf32>
    %c8_35 = arith.constant 8 : index
    %c0_36 = arith.constant 0 : index
    %109 = vector.load %arg11[%c8_35, %c0_36] : memref<16x32xf32, #tpu.memory_space<vmem>>, vector<2x32xf32>
    tpu.vector_store %arg11[%c8_35, %c0_36], %108 {strides = array<i32>} : memref<16x32xf32, #tpu.memory_space<vmem>>, vector<2x32xf32>,
    %c10 = arith.constant 10 : index
    %c0_37 = arith.constant 0 : index
    %110 = vector.load %arg10[%c10, %c0_37] : memref<16x128xf32, #tpu.memory_space<vmem>>, vector<2x128xf32>
    %111 = arith.truncf %108 : vector<2x32xf32> to vector<2x32xbf16>
    %cst_38 = arith.constant dense<0.000000e+00> : vector<2x128xf32>
    %112 = tpu.matmul %111, %7, %cst_38 {dimension_numbers = #tpu.dot_dimension_numbers<[1], [0], [0], [1], [0, 0, 1, 1], [], []>} : vector<2x32xbf16>, vector<32x128xbf16>, vector<2x128xf32> -> vector<2x128xf32>
    %113 = arith.addf %110, %112 : vector<2x128xf32>
    %114 = arith.negf %113 : vector<2x128xf32>
    %115 = math.exp %114 : vector<2x128xf32>
    %cst_39 = arith.constant 1.000000e+00 : f32
    %116 = vector.broadcast %cst_39 : f32 to vector<2x128xf32>
    %117 = arith.addf %116, %115 : vector<2x128xf32>
    %118 = arith.divf %116, %117 : vector<2x128xf32>
    %119 = vector.extract_strided_slice %113 {offsets = [0, 64], sizes = [2, 32], strides = [1, 1]} : vector<2x128xf32> to vector<2x32xf32>
    %120 = math.tanh %119 : vector<2x32xf32>
    %121 = vector.extract_strided_slice %118 {offsets = [0, 0], sizes = [2, 32], strides = [1, 1]} : vector<2x128xf32> to vector<2x32xf32>
    %122 = vector.extract_strided_slice %118 {offsets = [0, 32], sizes = [2, 32], strides = [1, 1]} : vector<2x128xf32> to vector<2x32xf32>
    %123 = vector.extract_strided_slice %118 {offsets = [0, 96], sizes = [2, 32], strides = [1, 1]} : vector<2x128xf32> to vector<2x32xf32>
    %124 = arith.mulf %122, %106 : vector<2x32xf32>
    %125 = arith.mulf %121, %120 : vector<2x32xf32>
    %126 = arith.addf %124, %125 : vector<2x32xf32>
    %127 = math.tanh %126 : vector<2x32xf32>
    %128 = arith.mulf %123, %127 : vector<2x32xf32>
    %c10_40 = arith.constant 10 : index
    %c0_41 = arith.constant 0 : index
    %129 = vector.load %arg11[%c10_40, %c0_41] : memref<16x32xf32, #tpu.memory_space<vmem>>, vector<2x32xf32>
    tpu.vector_store %arg11[%c10_40, %c0_41], %128 {strides = array<i32>} : memref<16x32xf32, #tpu.memory_space<vmem>>, vector<2x32xf32>,
    %c12 = arith.constant 12 : index
    %c0_42 = arith.constant 0 : index
    %130 = vector.load %arg10[%c12, %c0_42] : memref<16x128xf32, #tpu.memory_space<vmem>>, vector<2x128xf32>
    %131 = arith.truncf %128 : vector<2x32xf32> to vector<2x32xbf16>
    %cst_43 = arith.constant dense<0.000000e+00> : vector<2x128xf32>
    %132 = tpu.matmul %131, %7, %cst_43 {dimension_numbers = #tpu.dot_dimension_numbers<[1], [0], [0], [1], [0, 0, 1, 1], [], []>} : vector<2x32xbf16>, vector<32x128xbf16>, vector<2x128xf32> -> vector<2x128xf32>
    %133 = arith.addf %130, %132 : vector<2x128xf32>
    %134 = arith.negf %133 : vector<2x128xf32>
    %135 = math.exp %134 : vector<2x128xf32>
    %cst_44 = arith.constant 1.000000e+00 : f32
    %136 = vector.broadcast %cst_44 : f32 to vector<2x128xf32>
    %137 = arith.addf %136, %135 : vector<2x128xf32>
    %138 = arith.divf %136, %137 : vector<2x128xf32>
    %139 = vector.extract_strided_slice %133 {offsets = [0, 64], sizes = [2, 32], strides = [1, 1]} : vector<2x128xf32> to vector<2x32xf32>
    %140 = math.tanh %139 : vector<2x32xf32>
    %141 = vector.extract_strided_slice %138 {offsets = [0, 0], sizes = [2, 32], strides = [1, 1]} : vector<2x128xf32> to vector<2x32xf32>
    %142 = vector.extract_strided_slice %138 {offsets = [0, 32], sizes = [2, 32], strides = [1, 1]} : vector<2x128xf32> to vector<2x32xf32>
    %143 = vector.extract_strided_slice %138 {offsets = [0, 96], sizes = [2, 32], strides = [1, 1]} : vector<2x128xf32> to vector<2x32xf32>
    %144 = arith.mulf %142, %126 : vector<2x32xf32>
    %145 = arith.mulf %141, %140 : vector<2x32xf32>
    %146 = arith.addf %144, %145 : vector<2x32xf32>
    %147 = math.tanh %146 : vector<2x32xf32>
    %148 = arith.mulf %143, %147 : vector<2x32xf32>
    %c12_45 = arith.constant 12 : index
    %c0_46 = arith.constant 0 : index
    %149 = vector.load %arg11[%c12_45, %c0_46] : memref<16x32xf32, #tpu.memory_space<vmem>>, vector<2x32xf32>
    tpu.vector_store %arg11[%c12_45, %c0_46], %148 {strides = array<i32>} : memref<16x32xf32, #tpu.memory_space<vmem>>, vector<2x32xf32>,
    %c14 = arith.constant 14 : index
    %c0_47 = arith.constant 0 : index
    %150 = vector.load %arg10[%c14, %c0_47] : memref<16x128xf32, #tpu.memory_space<vmem>>, vector<2x128xf32>
    %151 = arith.truncf %148 : vector<2x32xf32> to vector<2x32xbf16>
    %cst_48 = arith.constant dense<0.000000e+00> : vector<2x128xf32>
    %152 = tpu.matmul %151, %7, %cst_48 {dimension_numbers = #tpu.dot_dimension_numbers<[1], [0], [0], [1], [0, 0, 1, 1], [], []>} : vector<2x32xbf16>, vector<32x128xbf16>, vector<2x128xf32> -> vector<2x128xf32>
    %153 = arith.addf %150, %152 : vector<2x128xf32>
    %154 = arith.negf %153 : vector<2x128xf32>
    %155 = math.exp %154 : vector<2x128xf32>
    %cst_49 = arith.constant 1.000000e+00 : f32
    %156 = vector.broadcast %cst_49 : f32 to vector<2x128xf32>
    %157 = arith.addf %156, %155 : vector<2x128xf32>
    %158 = arith.divf %156, %157 : vector<2x128xf32>
    %159 = vector.extract_strided_slice %153 {offsets = [0, 64], sizes = [2, 32], strides = [1, 1]} : vector<2x128xf32> to vector<2x32xf32>
    %160 = math.tanh %159 : vector<2x32xf32>
    %161 = vector.extract_strided_slice %158 {offsets = [0, 0], sizes = [2, 32], strides = [1, 1]} : vector<2x128xf32> to vector<2x32xf32>
    %162 = vector.extract_strided_slice %158 {offsets = [0, 32], sizes = [2, 32], strides = [1, 1]} : vector<2x128xf32> to vector<2x32xf32>
    %163 = vector.extract_strided_slice %158 {offsets = [0, 96], sizes = [2, 32], strides = [1, 1]} : vector<2x128xf32> to vector<2x32xf32>
    %164 = arith.mulf %162, %146 : vector<2x32xf32>
    %165 = arith.mulf %161, %160 : vector<2x32xf32>
    %166 = arith.addf %164, %165 : vector<2x32xf32>
    %167 = math.tanh %166 : vector<2x32xf32>
    %168 = arith.mulf %163, %167 : vector<2x32xf32>
    %c14_50 = arith.constant 14 : index
    %c0_51 = arith.constant 0 : index
    %169 = vector.load %arg11[%c14_50, %c0_51] : memref<16x32xf32, #tpu.memory_space<vmem>>, vector<2x32xf32>
    tpu.vector_store %arg11[%c14_50, %c0_51], %168 {strides = array<i32>} : memref<16x32xf32, #tpu.memory_space<vmem>>, vector<2x32xf32>,
    %c0_52 = arith.constant 0 : index
    %c0_53 = arith.constant 0 : index
    %170 = vector.load %arg8[%c0_52, %c0_53] : memref<2x32xf32, #tpu.memory_space<vmem>>, vector<2x32xf32>
    tpu.vector_store %arg8[%c0_52, %c0_53], %168 {strides = array<i32>} : memref<2x32xf32, #tpu.memory_space<vmem>>, vector<2x32xf32>,
    %c0_54 = arith.constant 0 : index
    %c0_55 = arith.constant 0 : index
    %171 = vector.load %arg9[%c0_54, %c0_55] : memref<2x32xf32, #tpu.memory_space<vmem>>, vector<2x32xf32>
    tpu.vector_store %arg9[%c0_54, %c0_55], %166 {strides = array<i32>} : memref<2x32xf32, #tpu.memory_space<vmem>>, vector<2x32xf32>,
    %c0_56 = arith.constant 0 : index
    %c0_57 = arith.constant 0 : index
    %172 = vector.load %arg11[%c0_56, %c0_57] : memref<16x32xf32, #tpu.memory_space<vmem>>, vector<16x32xf32>
    %173 = arith.truncf %172 : vector<16x32xf32> to vector<16x32xbf16>
    %c0_58 = arith.constant 0 : index
    %c0_59 = arith.constant 0 : index
    %174 = vector.load %arg4[%c0_58, %c0_59] : memref<32x896xbf16, #tpu.memory_space<vmem>>, vector<32x896xbf16>
    %cst_60 = arith.constant dense<0.000000e+00> : vector<16x896xf32>
    %175 = tpu.matmul %173, %174, %cst_60 {dimension_numbers = #tpu.dot_dimension_numbers<[1], [0], [0], [1], [0, 0, 1, 1], [], []>} : vector<16x32xbf16>, vector<32x896xbf16>, vector<16x896xf32> -> vector<16x896xf32>
    %c0_61 = arith.constant 0 : index
    %c0_62 = arith.constant 0 : index
    %176 = vector.load %arg5[%c0_61, %c0_62] : memref<1x896xf32, #tpu.memory_space<vmem>>, vector<1x896xf32>
    %177 = vector.broadcast %176 : vector<1x896xf32> to vector<16x896xf32>
    %178 = arith.addf %175, %177 : vector<16x896xf32>
    %179 = vector.extract_strided_slice %178 {offsets = [0, 0], sizes = [16, 256], strides = [1, 1]} : vector<16x896xf32> to vector<16x256xf32>
    %cst_63 = arith.constant dense<0xFF800000> : vector<16xf32>
    %180 = vector.multi_reduction <maximumf>, %179, %cst_63 [1] : vector<16x256xf32> to vector<16xf32>
    %181 = vector.shape_cast %180 : vector<16xf32> to vector<16x1xf32>
    %182 = vector.broadcast %181 : vector<16x1xf32> to vector<16x256xf32>
    %183 = arith.subf %179, %182 : vector<16x256xf32>
    %184 = math.exp %183 : vector<16x256xf32>
    %c0_64 = arith.constant 0 : index
    %c0_65 = arith.constant 0 : index
    %185 = vector.load %arg6[%c0_64, %c0_65] : memref<256x256xf32, #tpu.memory_space<vmem>>, vector<256x256xf32>
    %cst_66 = arith.constant dense<0.000000e+00> : vector<16x256xf32>
    %186 = tpu.matmul %184, %185, %cst_66 {dimension_numbers = #tpu.dot_dimension_numbers<[1], [0], [0], [1], [0, 0, 1, 1], [], []>} : vector<16x256xf32>, vector<256x256xf32>, vector<16x256xf32> -> vector<16x256xf32>
    %187 = tpu.reciprocal %186 {approx = true} : vector<16x256xf32> -> vector<16x256xf32>
    %188 = arith.mulf %184, %187 : vector<16x256xf32>
    %c0_67 = arith.constant 0 : index
    %c0_68 = arith.constant 0 : index
    %189 = vector.load %arg7[%c0_67, %c0_68] : memref<16x896xf32, #tpu.memory_space<vmem>>, vector<16x256xf32>
    tpu.vector_store %arg7[%c0_67, %c0_68], %188 {strides = array<i32>} : memref<16x896xf32, #tpu.memory_space<vmem>>, vector<16x256xf32>,
    %190 = vector.extract_strided_slice %178 {offsets = [0, 256], sizes = [16, 256], strides = [1, 1]} : vector<16x896xf32> to vector<16x256xf32>
    %c0_69 = arith.constant 0 : index
    %c256 = arith.constant 256 : index
    %191 = vector.load %arg7[%c0_69, %c256] : memref<16x896xf32, #tpu.memory_space<vmem>>, vector<16x256xf32>
    tpu.vector_store %arg7[%c0_69, %c256], %190 {strides = array<i32>} : memref<16x896xf32, #tpu.memory_space<vmem>>, vector<16x256xf32>,
    %192 = vector.extract_strided_slice %178 {offsets = [0, 512], sizes = [16, 256], strides = [1, 1]} : vector<16x896xf32> to vector<16x256xf32>
    %193 = math.exp %192 : vector<16x256xf32>
    %c0_70 = arith.constant 0 : index
    %c512 = arith.constant 512 : index
    %194 = vector.load %arg7[%c0_70, %c512] : memref<16x896xf32, #tpu.memory_space<vmem>>, vector<16x256xf32>
    tpu.vector_store %arg7[%c0_70, %c512], %193 {strides = array<i32>} : memref<16x896xf32, #tpu.memory_space<vmem>>, vector<16x256xf32>,
    %195 = vector.extract_strided_slice %178 {offsets = [0, 768], sizes = [16, 128], strides = [1, 1]} : vector<16x896xf32> to vector<16x128xf32>
    %196 = tpu.iota {dimensions = array<i32: 1>} : vector<16x128xi32>
    %c1_i32 = arith.constant 1 : i32
    %197 = vector.broadcast %c1_i32 : i32 to vector<16x128xi32>
    %198 = arith.cmpi eq, %196, %197 : vector<16x128xi32>
    %199 = arith.negf %195 : vector<16x128xf32>
    %200 = math.exp %199 : vector<16x128xf32>
    %cst_71 = arith.constant 1.000000e+00 : f32
    %201 = vector.broadcast %cst_71 : f32 to vector<16x128xf32>
    %202 = arith.addf %201, %200 : vector<16x128xf32>
    %203 = arith.divf %201, %202 : vector<16x128xf32>
    %204 = arith.select %198, %203, %195 : vector<16x128xi1>, vector<16x128xf32>
    %c0_72 = arith.constant 0 : index
    %c768 = arith.constant 768 : index
    %205 = vector.load %arg7[%c0_72, %c768] : memref<16x896xf32, #tpu.memory_space<vmem>>, vector<16x128xf32>
    tpu.vector_store %arg7[%c0_72, %c768], %204 {strides = array<i32>} : memref<16x896xf32, #tpu.memory_space<vmem>>, vector<16x128xf32>,
    return
  }
}

</mosaic_0001>

<bundles_post_ra>
// kernel: mmodel_forward.1
= control target key start
LH: loop header
LB: loop body
LE: loop exit
PB: predicated region body
PF: predicated region fallthrough
CT: control target
= control target key end

     0   :  { %15 = vsyncpa [#allocation5], 0  ;;  %s2145_s0 = inlined_call_operand.vmem [shape: bf16[16,36], index: 0, kind: input, shape index: {}]   ;;  %s2146_s1 = inlined_call_operand.vmem [shape: bf16[36,128], index: 1, kind: input, shape index: {}]   ;;  %s2147_s2 = inlined_call_operand.vmem [shape: bf16[32,128], index: 2, kind: input, shape index: {}]   ;;  %s2148_s3 = inlined_call_operand.vmem [shape: f32[1,128], index: 3, kind: input, shape index: {}]   ;;  %s2149_s4 = inlined_call_operand.hbm [shape: bf16[32,896], index: 4, kind: input, shape index: {}]   ;;  %s2150_s5 = inlined_call_operand.vmem [shape: f32[1,896], index: 5, kind: input, shape index: {}]   ;;  %s2151_s6 = inlined_call_operand.hbm [shape: f32[256,256], index: 6, kind: input, shape index: {}]   ;;  %s2152_s7 = inlined_call_operand.vmem [shape: f32[16,896], index: 7, kind: output, shape index: {0}]   ;;  %s2153_s8 = inlined_call_operand.hbm [shape: f32[2,32], index: 8, kind: output, shape index: {1}]   ;;  %s2154_s9 = inlined_call_operand.hbm [shape: f32[2,32], index: 9, kind: output, shape index: {2}]  }
   0x1   :  { %16 = vsyncpa [#allocation8], 0 }
   0x2   :  { %17 = vsyncpa [#allocation6], 0 }
   0x3   :  { %18 = vsyncpa [#allocation11], 0  ;;  %s1782_s30 = smov [#allocation4]   ;;  %s1686_s13 = scalar_lea.hbm %s2149_s4, 1792 }
   0x4   :  { %s32_s10 = sshll.u32 %s1782_s30, 4  ;;  %p1687_p0 = scmp.ne.s32.totalorder %s2149_s4, %s1686_s13  ;;  %s33_s10 = int_to_ptr.vmem [resolvable:$true] %s32_s10 }
   0x5   :  { %p1690_p1 = scmp.lt.u32.totalorder %s1686_s13, %s2149_s4 }
   0x7   :  { %p1692_p2 = pnand %p1690_p1, %p1687_p0 }
   0x9   :  { %1695 = shalt.err (!%p1692_p2)
}
   0xa   :  { %s1696_s18 = scalar_lea.vmem %s33_s10, 1792  ;;  %p1701_p4 = scmp.lt.s32.totalorder %s33_s10, %s33_s10 }
   0xb   :  { %p1697_p3 = scmp.ne.s32.totalorder %s33_s10, %s1696_s18  ;;  %p1702_p5 = scmp.lt.s32.totalorder %s1696_s18, %s1696_s18 }
   0xd   :  { %p1703_p6 = por %p1702_p5, %p1701_p4 }
   0xf   :  { %p1704_p7 = pnand %p1703_p6, %p1697_p3 }
  0x11   :  { %1707 = shalt.err (!%p1704_p7)
}
  0x12   :  { %s1783_s19 = smov 448   ;;  %s1784_s20 = smov 28  }
  0x13   :  { %38 = dma.hbm_to_vmem [thread:$0]  %s2149_s4, 1792, %s33_s10, [#allocation5], %s1783_s19, %s1783_s19, %s1784_s20  }
  0x14   :  { %s1785_s23 = smov [#allocation7]   ;;  %s1708_s27 = scalar_lea.hbm %s2151_s6, 8192 }
  0x15   :  { %s46_s24 = sshll.u32 %s1785_s23, 4  ;;  %p1709_p8 = scmp.ne.s32.totalorder %s2151_s6, %s1708_s27  ;;  %s47_s24 = int_to_ptr.vmem [resolvable:$true] %s46_s24 }
  0x16   :  { %p1712_p9 = scmp.lt.u32.totalorder %s1708_s27, %s2151_s6 }
  0x18   :  { %p1714_p10 = pnand %p1712_p9, %p1709_p8 }
  0x1a   :  { %1717 = shalt.err (!%p1714_p10)
}
  0x1b   :  { %s1718_s12 = scalar_lea.vmem %s47_s24, 8192  ;;  %p1723_p12 = scmp.lt.s32.totalorder %s47_s24, %s47_s24 }
  0x1c   :  { %p1719_p11 = scmp.ne.s32.totalorder %s47_s24, %s1718_s12  ;;  %p1724_p13 = scmp.lt.s32.totalorder %s1718_s12, %s1718_s12 }
  0x1e   :  { %p1725_p0 = por %p1724_p13, %p1723_p12 }
  0x20   :  { %p1726_p1 = pnand %p1725_p0, %p1719_p11 }
  0x22   :  { %1729 = shalt.err (!%p1726_p1)
}
  0x23   :  { %s1786_s4 = smov 256   ;;  %s1787_s10 = smov 16  }
  0x24   :  { %52 = dma.hbm_to_vmem [thread:$0]  %s2151_s6, 8192, %s47_s24, [#allocation8], %s1786_s4, %s1786_s4, %s1787_s10  }
  0x25   :  { %1774 = dma.done.wait [#allocation5], 1792  }
  0x26   :  { %1775 = vsyncadd [#allocation5], 4294965504 }
  0x27   :  { %1776 = dma.done.wait [#allocation8], 8192  }
  0x28   :  { %1777 = vsyncadd [#allocation8], 4294959104  ;;  %v1788_v0 = vmov 0.0   ;;  %vm1789_vm0 = vmmov 0   ;;  %v1564_v1 = vld [vmem:[%s2146_s1] sm:$0xff]   ;;  %v1565_v2 = vld [vmem:[%s2146_s1 + $0x8] sm:$0xff]  }
  0x29   :  { %1404 = vmatprep.subr.bf16.mxu1 %v1788_v0  ;;  %1410 = vmatprep.mubr.msk.bf16.mxu1 %vm1789_vm0, %v1788_v0  ;;  %v1566_v3 = vld [vmem:[%s2146_s1 + $0x10] ss:$0 sps:$4 sm:$0x33]   ;;  %vm98_vm1 = vcmask 1041408   ;;  %v1889_v4 = vld [vmem:[%s2147_s2] sm:$0xff]   ;;  %v1894_v5 = vld [vmem:[%s2147_s2 + $0x8] sm:$0xff]  }
  0x2a   :  { %1462 = vmatprep.subr.bf16.mxu0 %v1788_v0  ;;  %1466 = vmatprep.mubr.msk.bf16.mxu0 %vm1789_vm0, %v1788_v0  ;;  %v100_v6 = vsel %vm98_vm1, %v1566_v3, 0  ;;  %v1567_v7 = vld [vmem:[%s2145_s0] sm:$0xff]   ;;  %vm94_vm2 = vcmask 293888   ;;  %v1790_v8 = vmov 0   ;;  %s1791_s25 = smov 64   ;;  %vm162_vm3 = vcmask 261120  }
  0x2b   :  { %1405 = vmatpush3.bf16.msra.mxu1 %v1564_v1  ;;  %1463 = vmatpush3.bf16.msra.mxu0 %v1889_v4  ;;  %v1330_v9 = vld [vmem:[%s2148_s3] ss:$0 sm:$0xff]  ;;  %s1792_s3 = smov 32   ;;  %vm235_vm4 = vcmask 254976   ;;  %s1793_s20 = smov 96  }
  0x2c   :  { %1406 = vmatprep.subr.bf16.mxu1 %v1788_v0  ;;  %1464 = vmatprep.subr.bf16.mxu0 %v1788_v0  ;;  %s1794_s24 = smov [#allocation9]   ;;  %s1795_s2 = smov [#allocation10]  }
  0x2d   :  { %s1304_s0 = sshll.u32 %s1794_s24, 4  ;;  %s1305_s0 = int_to_ptr.vmem [resolvable:$true] %s1304_s0 }
  0x2e   :  { %p1735_p3 = scmp.lt.s32.totalorder %s1305_s0, %s1305_s0 }
  0x2f   :  { %1407 = vmatpush3.bf16.msra.mxu1 %v1565_v2  ;;  %1465 = vmatpush3.bf16.msra.mxu0 %v1894_v5 }
  0x30   :  { %1408 = vmatprep.subr.bf16.mxu1 %v1788_v0 }
  0x33   :  { %1409 = vmatpush3.bf16.msra.mxu1 %v100_v6 }
  0x34   :  { %1414 = vmatprep.subr.bf16.mxu1 %v1788_v0 }
  0x36   :  { %1411 = vmatmul.mubr.msk.bf16.vlgmr.msra.gmra.mrb[0].mxu1 %vm94_vm2, %v1567_v7 }
  0x37   :  { %1415 = vmatpush3.bf16.msra.mxu1 %v1889_v4  ;;  %1418 = vmatprep.mubr.msk.bf16.mxu1 %vm1789_vm0, %v1788_v0 }
  0x38   :  { %1416 = vmatprep.subr.bf16.mxu1 %v1788_v0 }
  0x3b   :  { %1417 = vmatpush3.bf16.msra.mxu1 %v1894_v5 }
  0x3c   :  { %1422 = vmatprep.subr.bf16.mxu1 %v1788_v0 }
  0x3e   :  { %1419 = vmatmul.mubr.bf16.vlgmr.msra.gmra.mrb[4].mxu1 %v1790_v8 }
  0x3f   :  { %1423 = vmatpush3.bf16.msra.mxu1 %v1889_v4  ;;  %1426 = vmatprep.mubr.msk.bf16.mxu1 %vm1789_vm0, %v1788_v0 }
  0x40   :  { %1424 = vmatprep.subr.bf16.mxu1 %v1788_v0 }
  0x43   :  { %1425 = vmatpush3.bf16.msra.mxu1 %v1894_v5 }
  0x44   :  { %1430 = vmatprep.subr.bf16.mxu1 %v1788_v0 }
 0x109   :  { %v136_v10 = vpop.f32.mrb[0].mxu1 }
 0x10a   :  { %v137_v11 = vadd.f32 %v1330_v9, %v136_v10  ;;  %v1412_v12 = vpop.f32.mrb[1].mxu1 }
 0x10b   :  { %v139_v13 = vpop.f32.mrb[2].mxu1 }
 0x10c   :  { %143 = vst [vmem:[#allocation2] sm:$0xff] %v137_v11  ;;  %v140_v14 = vadd.f32 %v1330_v9, %v139_v13  ;;  %v1413_v15 = vpop.f32.mrb[3].mxu1 }
 0x10e   :  { %144 = vst [vmem:[#allocation2 + $0x8] sm:$0xff] %v140_v14 }
 0x111   :  { %v200_v16 = vpop.f32.mrb[4].mxu1 }
 0x112   :  { %v1420_v17 = vpop.f32.mrb[5].mxu1 }
 0x113   :  { %v149_v18 = vld [vmem:[#allocation2] sm:$0x3]  ;;  %v203_v19 = vpop.f32.mrb[6].mxu1  ;;  %v237_v37 = vld [vmem:[#allocation2 + $0x2] sm:$0x3] }
 0x114   :  { %v206_v20 = vadd.f32 %v200_v16, %v149_v18  ;;  %v1421_v21 = vpop.f32.mrb[7].mxu1  ;;  %v315_v58 = vld [vmem:[#allocation2 + $0x4] sm:$0x3]  ;;  %v393_v19 = vld [vmem:[#allocation2 + $0x6] sm:$0x3] }
 0x116   :  { %1590 = vtanh.f32 %v206_v20  ;;  %v1338_v23 = vmul.f32 -1.442695, %v206_v20 }
 0x118   :  { %1592 = vpow2.f32 %v1338_v23 }
 0x120   :  { %v1591_v22 = vpop.eup %1590 }
 0x121   :  { %216 = vrot.lane.b32.xlu0 %v1591_v22, %s1791_s25 }
 0x122   :  { %v1593_v24 = vpop.eup %1592 }
 0x123   :  { %v210_v25 = vadd.f32 1.0, %v1593_v24 }
 0x125   :  { %1594 = vrcp.f32 %v210_v25 }
 0x12f   :  { %v1595_v26 = vpop.eup %1594 }
 0x130   :  { %v214_v29 = vmul.f32 0.0, %v1595_v26 }
 0x193   :  { %v217_v27 = vpop.permute.xlu0 %216 }
 0x194   :  { %v219_v28 = vmul.f32 %v1595_v26, %v217_v27 }
 0x196   :  { %221 = vrot.lane.b32.xlu0 %v219_v28, %s1792_s3 }
 0x208   :  { %v222_v30 = vpop.permute.xlu0 %221 }
 0x209   :  { %v224_v31 = vadd.f32 %v222_v30, %v214_v29 }
 0x20b   :  { %1596 = vtanh.f32 %v224_v31 }
 0x215   :  { %v1597_v32 = vpop.eup %1596 }
 0x216   :  { %227 = vrot.lane.b32.xlu1 %v1597_v32, %s1791_s25 }
 0x288   :  { %v228_v33 = vpop.permute.xlu1 %227 }
 0x289   :  { %v1923_v34 = vmul.f32 %v1595_v26, %v228_v33 }
 0x28b   :  { %v238_v35 = vpack.c.bf16 %v1923_v34, %v1923_v34 }
 0x28d   :  { %240 = vrot.lane.b32.xlu1 %v238_v35, %s1792_s3 }
 0x2ff   :  { %v241_v36 = vpop.permute.xlu1 %240 }
 0x300   :  { %1427 = vmatmul.mubr.msk.bf16.vlgmr.msra.gmra.mrb[8].mxu1 %vm162_vm3, %v241_v36 }
 0x301   :  { %1431 = vmatpush3.bf16.msra.mxu1 %v1889_v4  ;;  %1434 = vmatprep.mubr.msk.bf16.mxu1 %vm1789_vm0, %v1788_v0 }
 0x302   :  { %1432 = vmatprep.subr.bf16.mxu1 %v1788_v0 }
 0x305   :  { %1433 = vmatpush3.bf16.msra.mxu1 %v1894_v5 }
 0x306   :  { %1438 = vmatprep.subr.bf16.mxu1 %v1788_v0 }
 0x3d3   :  { %v279_v38 = vpop.f32.mrb[8].mxu1 }
 0x3d4   :  { %v285_v39 = vadd.f32 %v279_v38, %v237_v37  ;;  %v1428_v40 = vpop.f32.mrb[9].mxu1 }
 0x3d5   :  { %v282_v41 = vpop.f32.mrb[10].mxu1 }
 0x3d6   :  { %1598 = vtanh.f32 %v285_v39  ;;  %v1429_v42 = vpop.f32.mrb[11].mxu1  ;;  %v1340_v44 = vmul.f32 -1.442695, %v285_v39  ;;  %v471_v41 = vld [vmem:[#allocation2 + $0x8] sm:$0x3] }
 0x3d8   :  { %1600 = vpow2.f32 %v1340_v44 }
 0x3e0   :  { %v1599_v43 = vpop.eup %1598 }
 0x3e1   :  { %295 = vrot.lane.b32.xlu0 %v1599_v43, %s1791_s25 }
 0x3e2   :  { %v1601_v45 = vpop.eup %1600 }
 0x3e3   :  { %v289_v46 = vadd.f32 1.0, %v1601_v45 }
 0x3e5   :  { %1602 = vrcp.f32 %v289_v46 }
 0x3ef   :  { %v1603_v47 = vpop.eup %1602 }
 0x3f0   :  { %v293_v50 = vmul.f32 %v1603_v47, %v224_v31 }
 0x453   :  { %v296_v48 = vpop.permute.xlu0 %295 }
 0x454   :  { %v298_v49 = vmul.f32 %v1603_v47, %v296_v48 }
 0x456   :  { %300 = vrot.lane.b32.xlu1 %v298_v49, %s1792_s3 }
 0x4c8   :  { %v301_v51 = vpop.permute.xlu1 %300 }
 0x4c9   :  { %v303_v52 = vadd.f32 %v301_v51, %v293_v50 }
 0x4cb   :  { %1604 = vtanh.f32 %v303_v52 }
 0x4d5   :  { %v1605_v53 = vpop.eup %1604 }
 0x4d6   :  { %306 = vrot.lane.b32.xlu0 %v1605_v53, %s1791_s25 }
 0x548   :  { %v307_v54 = vpop.permute.xlu0 %306 }
 0x549   :  { %v1938_v55 = vmul.f32 %v1603_v47, %v307_v54 }
 0x54b   :  { %v316_v56 = vpack.c.bf16 %v1938_v55, %v1938_v55 }
 0x54d   :  { %318 = vrot.lane.b32.xlu1 %v316_v56, %s1792_s3 }
 0x5bf   :  { %v319_v57 = vpop.permute.xlu1 %318 }
 0x5c0   :  { %1435 = vmatmul.mubr.msk.bf16.vlgmr.msra.gmra.mrb[12].mxu1 %vm162_vm3, %v319_v57 }
 0x5c1   :  { %1439 = vmatpush3.bf16.msra.mxu1 %v1889_v4  ;;  %1442 = vmatprep.mubr.msk.bf16.mxu1 %vm1789_vm0, %v1788_v0 }
 0x5c2   :  { %1440 = vmatprep.subr.bf16.mxu1 %v1788_v0 }
 0x5c5   :  { %1441 = vmatpush3.bf16.msra.mxu1 %v1894_v5 }
 0x5c6   :  { %1446 = vmatprep.subr.bf16.mxu1 %v1788_v0 }
 0x693   :  { %v357_v59 = vpop.f32.mrb[12].mxu1 }
 0x694   :  { %v363_v60 = vadd.f32 %v357_v59, %v315_v58  ;;  %v1436_v61 = vpop.f32.mrb[13].mxu1 }
 0x695   :  { %v360_v62 = vpop.f32.mrb[14].mxu1 }
 0x696   :  { %1606 = vtanh.f32 %v363_v60  ;;  %v1437_v63 = vpop.f32.mrb[15].mxu1  ;;  %v1342_v2 = vmul.f32 -1.442695, %v363_v60 }
 0x697   :  { %v549_v63 = vld [vmem:[#allocation2 + $0xa] sm:$0x3] }
 0x698   :  { %1608 = vpow2.f32 %v1342_v2 }
 0x6a0   :  { %v1607_v1 = vpop.eup %1606 }
 0x6a1   :  { %373 = vrot.lane.b32.xlu0 %v1607_v1, %s1791_s25 }
 0x6a2   :  { %v1609_v3 = vpop.eup %1608 }
 0x6a3   :  { %v367_v6 = vadd.f32 1.0, %v1609_v3 }
 0x6a5   :  { %1610 = vrcp.f32 %v367_v6 }
 0x6af   :  { %v1611_v7 = vpop.eup %1610 }
 0x6b0   :  { %v371_v11 = vmul.f32 %v1611_v7, %v303_v52 }
 0x713   :  { %v374_v9 = vpop.permute.xlu0 %373 }
 0x714   :  { %v376_v10 = vmul.f32 %v1611_v7, %v374_v9 }
 0x716   :  { %378 = vrot.lane.b32.xlu1 %v376_v10, %s1792_s3 }
 0x788   :  { %v379_v12 = vpop.permute.xlu1 %378 }
 0x789   :  { %v381_v13 = vadd.f32 %v379_v12, %v371_v11 }
 0x78b   :  { %1612 = vtanh.f32 %v381_v13 }
 0x795   :  { %v1613_v14 = vpop.eup %1612 }
 0x796   :  { %384 = vrot.lane.b32.xlu0 %v1613_v14, %s1791_s25 }
 0x808   :  { %v385_v15 = vpop.permute.xlu0 %384 }
 0x809   :  { %v1953_v16 = vmul.f32 %v1611_v7, %v385_v15 }
 0x80b   :  { %v394_v17 = vpack.c.bf16 %v1953_v16, %v1953_v16 }
 0x80d   :  { %396 = vrot.lane.b32.xlu1 %v394_v17, %s1792_s3 }
 0x87f   :  { %v397_v18 = vpop.permute.xlu1 %396 }
 0x880   :  { %1443 = vmatmul.mubr.msk.bf16.vlgmr.msra.gmra.mrb[16].mxu1 %vm162_vm3, %v397_v18 }
 0x881   :  { %1447 = vmatpush3.bf16.msra.mxu1 %v1889_v4  ;;  %1450 = vmatprep.mubr.msk.bf16.mxu1 %vm1789_vm0, %v1788_v0 }
 0x882   :  { %1448 = vmatprep.subr.bf16.mxu1 %v1788_v0 }
 0x885   :  { %1449 = vmatpush3.bf16.msra.mxu1 %v1894_v5 }
 0x886   :  { %1454 = vmatprep.subr.bf16.mxu1 %v1788_v0 }
 0x953   :  { %v435_v20 = vpop.f32.mrb[16].mxu1 }
 0x954   :  { %v441_v21 = vadd.f32 %v435_v20, %v393_v19  ;;  %v1444_v22 = vpop.f32.mrb[17].mxu1 }
 0x955   :  { %v438_v23 = vpop.f32.mrb[18].mxu1 }
 0x956   :  { %1614 = vtanh.f32 %v441_v21  ;;  %v1445_v24 = vpop.f32.mrb[19].mxu1  ;;  %v1344_v26 = vmul.f32 -1.442695, %v441_v21  ;;  %v627_v23 = vld [vmem:[#allocation2 + $0xc] sm:$0x3] }
 0x958   :  { %1616 = vpow2.f32 %v1344_v26 }
 0x960   :  { %v1615_v25 = vpop.eup %1614 }
 0x961   :  { %451 = vrot.lane.b32.xlu0 %v1615_v25, %s1791_s25 }
 0x962   :  { %v1617_v27 = vpop.eup %1616 }
 0x963   :  { %v445_v28 = vadd.f32 1.0, %v1617_v27 }
 0x965   :  { %1618 = vrcp.f32 %v445_v28 }
 0x96f   :  { %v1619_v29 = vpop.eup %1618 }
 0x970   :  { %v449_v32 = vmul.f32 %v1619_v29, %v381_v13 }
 0x9d3   :  { %v452_v30 = vpop.permute.xlu0 %451 }
 0x9d4   :  { %v454_v31 = vmul.f32 %v1619_v29, %v452_v30 }
 0x9d6   :  { %456 = vrot.lane.b32.xlu1 %v454_v31, %s1792_s3 }
 0xa48   :  { %v457_v33 = vpop.permute.xlu1 %456 }
 0xa49   :  { %v459_v35 = vadd.f32 %v457_v33, %v449_v32 }
 0xa4b   :  { %1620 = vtanh.f32 %v459_v35 }
 0xa55   :  { %v1621_v36 = vpop.eup %1620 }
 0xa56   :  { %462 = vrot.lane.b32.xlu0 %v1621_v36, %s1791_s25 }
 0xac8   :  { %v463_v37 = vpop.permute.xlu0 %462 }
 0xac9   :  { %v1968_v38 = vmul.f32 %v1619_v29, %v463_v37 }
 0xacb   :  { %v472_v39 = vpack.c.bf16 %v1968_v38, %v1968_v38 }
 0xacd   :  { %474 = vrot.lane.b32.xlu1 %v472_v39, %s1792_s3 }
 0xb3f   :  { %v475_v40 = vpop.permute.xlu1 %474 }
 0xb40   :  { %1451 = vmatmul.mubr.msk.bf16.vlgmr.msra.gmra.mrb[20].mxu1 %vm162_vm3, %v475_v40 }
 0xb41   :  { %1455 = vmatpush3.bf16.msra.mxu1 %v1889_v4  ;;  %1458 = vmatprep.mubr.msk.bf16.mxu1 %vm1789_vm0, %v1788_v0 }
 0xb42   :  { %1456 = vmatprep.subr.bf16.mxu1 %v1788_v0 }
 0xb45   :  { %1457 = vmatpush3.bf16.msra.mxu1 %v1894_v5 }
 0xb46   :  { %1470 = vmatprep.subr.bf16.mxu1 %v1788_v0 }
 0xc13   :  { %v513_v42 = vpop.f32.mrb[20].mxu1 }
 0xc14   :  { %v519_v43 = vadd.f32 %v513_v42, %v471_v41  ;;  %v1452_v44 = vpop.f32.mrb[21].mxu1 }
 0xc15   :  { %v516_v45 = vpop.f32.mrb[22].mxu1 }
 0xc16   :  { %1622 = vtanh.f32 %v519_v43  ;;  %v1453_v46 = vpop.f32.mrb[23].mxu1  ;;  %v1346_v48 = vmul.f32 -1.442695, %v519_v43 }
 0xc17   :  { %v705_v46 = vld [vmem:[#allocation2 + $0xe] sm:$0x3] }
 0xc18   :  { %1624 = vpow2.f32 %v1346_v48 }
 0xc20   :  { %v1623_v47 = vpop.eup %1622 }
 0xc21   :  { %529 = vrot.lane.b32.xlu0 %v1623_v47, %s1791_s25 }
 0xc22   :  { %v1625_v49 = vpop.eup %1624 }
 0xc23   :  { %v523_v50 = vadd.f32 1.0, %v1625_v49 }
 0xc25   :  { %1626 = vrcp.f32 %v523_v50 }
 0xc2f   :  { %v1627_v51 = vpop.eup %1626 }
 0xc30   :  { %v527_v54 = vmul.f32 %v1627_v51, %v459_v35 }
 0xc93   :  { %v530_v52 = vpop.permute.xlu0 %529 }
 0xc94   :  { %v532_v53 = vmul.f32 %v1627_v51, %v530_v52 }
 0xc96   :  { %534 = vrot.lane.b32.xlu1 %v532_v53, %s1792_s3 }
 0xd08   :  { %v535_v56 = vpop.permute.xlu1 %534 }
 0xd09   :  { %v537_v57 = vadd.f32 %v535_v56, %v527_v54 }
 0xd0b   :  { %1628 = vtanh.f32 %v537_v57 }
 0xd15   :  { %v1629_v58 = vpop.eup %1628 }
 0xd16   :  { %540 = vrot.lane.b32.xlu0 %v1629_v58, %s1791_s25 }
 0xd88   :  { %v541_v59 = vpop.permute.xlu0 %540 }
 0xd89   :  { %v1983_v60 = vmul.f32 %v1627_v51, %v541_v59 }
 0xd8b   :  { %v550_v61 = vpack.c.bf16 %v1983_v60, %v1983_v60 }
 0xd8d   :  { %552 = vrot.lane.b32.xlu1 %v550_v61, %s1792_s3 }
 0xdff   :  { %v553_v62 = vpop.permute.xlu1 %552 }
 0xe00   :  { %1459 = vmatmul.mubr.msk.bf16.vlgmr.msra.gmra.mrb[24].mxu1 %vm162_vm3, %v553_v62 }
 0xe01   :  { %1471 = vmatpush3.bf16.msra.mxu1 %v1889_v4  ;;  %1474 = vmatprep.mubr.msk.bf16.mxu1 %vm1789_vm0, %v1788_v0 }
 0xe02   :  { %1472 = vmatprep.subr.bf16.mxu1 %v1788_v0 }
 0xe05   :  { %1473 = vmatpush3.bf16.msra.mxu1 %v1894_v5 }
 0xed3   :  { %v591_v1 = vpop.f32.mrb[24].mxu1 }
 0xed4   :  { %v597_v2 = vadd.f32 %v591_v1, %v549_v63  ;;  %v1460_v3 = vpop.f32.mrb[25].mxu1 }
 0xed5   :  { %v594_v6 = vpop.f32.mrb[26].mxu1  ;;  %v1570_v3 = vld [vmem:[#allocation4] ss:$28 sps:$4 sm:$0xff]  }
 0xed6   :  { %1630 = vtanh.f32 %v597_v2  ;;  %v1461_v7 = vpop.f32.mrb[27].mxu1  ;;  %v1348_v10 = vmul.f32 -1.442695, %v597_v2  ;;  %v1572_v6 = vld [vmem:[#allocation4 + $0x4] ss:$28 sps:$4 sm:$0xff]  }
 0xed7   :  { %v1573_v7 = vld [vmem:[#allocation4 + $0x8] ss:$28 sps:$4 sm:$0xff]   ;;  %920 = vmatprep.subr.bf16.mxu0 %v1572_v6  ;;  %v1137_v6 = vld [vmem:[#allocation7 + $0xe8] sm:$0xff] }
 0xed8   :  { %1632 = vpow2.f32 %v1348_v10  ;;  %v1578_v10 = vld [vmem:[#allocation4 + $0x3c] ss:$28 sps:$4 sm:$0xff]  }
 0xee0   :  { %v1631_v9 = vpop.eup %1630 }
 0xee1   :  { %607 = vrot.lane.b32.xlu0 %v1631_v9, %s1791_s25  ;;  %v1575_v9 = vld [vmem:[#allocation4 + $0xc] ss:$28 sps:$4 sm:$0xff]  }
 0xee2   :  { %v1633_v4 = vpop.eup %1632  ;;  %963 = vmatprep.subr.bf16.mxu1 %v1575_v9 }
 0xee3   :  { %v601_v11 = vadd.f32 1.0, %v1633_v4  ;;  %v1581_v4 = vld [vmem:[#allocation4 + $0x44] ss:$28 sps:$4 sm:$0xff]  }
 0xee5   :  { %1634 = vrcp.f32 %v601_v11  ;;  %v1576_v11 = vld [vmem:[#allocation4 + $0x38] ss:$28 sps:$4 sm:$0xff]  }
 0xeef   :  { %v1635_v12 = vpop.eup %1634 }
 0xef0   :  { %v605_v5 = vmul.f32 %v1635_v12, %v537_v57 }
 0xf53   :  { %v608_v13 = vpop.permute.xlu0 %607 }
 0xf54   :  { %v610_v14 = vmul.f32 %v1635_v12, %v608_v13 }
 0xf56   :  { %612 = vrot.lane.b32.xlu1 %v610_v14, %s1792_s3 }
 0xfc8   :  { %v613_v15 = vpop.permute.xlu1 %612 }
 0xfc9   :  { %v615_v17 = vadd.f32 %v613_v15, %v605_v5 }
 0xfcb   :  { %1636 = vtanh.f32 %v615_v17 }
 0xfd5   :  { %v1637_v18 = vpop.eup %1636 }
 0xfd6   :  { %618 = vrot.lane.b32.xlu0 %v1637_v18, %s1791_s25  ;;  %v1582_v18 = vld [vmem:[#allocation4 + $0x10] ss:$28 sps:$4 sm:$0xff]  }
0x1048   :  { %v619_v19 = vpop.permute.xlu0 %618 }
0x1049   :  { %v1997_v20 = vmul.f32 %v1635_v12, %v619_v19  ;;  %v1579_v12 = vld [vmem:[#allocation4 + $0x40] ss:$28 sps:$4 sm:$0xff]  }
0x104b   :  { %v628_v21 = vpack.c.bf16 %v1997_v20, %v1997_v20 }
0x104d   :  { %630 = vrot.lane.b32.xlu1 %v628_v21, %s1792_s3  ;;  %v1585_v21 = vld [vmem:[#allocation4 + $0x18] ss:$28 sps:$4 sm:$0xff]  }
0x10bf   :  { %v631_v22 = vpop.permute.xlu1 %630 }
0x10c0   :  { %1467 = vmatmul.mubr.msk.bf16.vlgmr.msra.gmra.mrb[0].mxu0 %vm162_vm3, %v631_v22 }
0x10c1   :  { %952 = vmatprep.mubr.bf16.mxu0 %v1790_v8  ;;  %921 = vmatpush1.bf16.msra.mxu0 %v1570_v3  ;;  %v1134_v3 = vld [vmem:[#allocation7 + $0xd0] sm:$0xff] }
0x10c2   :  { %922 = vmatprep.subr.bf16.mxu0 %v1578_v10 }
0x10c5   :  { %923 = vmatpush1.bf16.msra.mxu0 %v1576_v11  ;;  %v1138_v11 = vld [vmem:[#allocation7 + $0xf0] sm:$0xff] }
0x1193   :  { %v669_v24 = vpop.f32.mrb[0].mxu0 }
0x1194   :  { %v675_v25 = vadd.f32 %v669_v24, %v627_v23  ;;  %v1468_v26 = vpop.f32.mrb[1].mxu0  ;;  %v1588_v23 = vld [vmem:[#allocation4 + $0x4c] ss:$28 sps:$4 sm:$0xff]  }
0x1195   :  { %v672_v27 = vpop.f32.mrb[2].mxu0  ;;  %v1586_v24 = vld [vmem:[#allocation4 + $0x48] ss:$28 sps:$4 sm:$0xff]   ;;  %v1109_v26 = vld [vmem:[#allocation7 + $0x8] sm:$0xff] }
0x1196   :  { %1638 = vtanh.f32 %v675_v25  ;;  %v1469_v28 = vpop.f32.mrb[3].mxu0  ;;  %v1350_v30 = vmul.f32 -1.442695, %v675_v25  ;;  %v1589_v25 = vld [vmem:[#allocation4 + $0x50] ss:$28 sps:$4 sm:$0xff]  }
0x1197   :  { %v1111_v27 = vld [vmem:[#allocation7 + $0x18] sm:$0xff]  ;;  %v1108_v28 = vld [vmem:[#allocation7] sm:$0xff] }
0x1198   :  { %1640 = vpow2.f32 %v1350_v30  ;;  %v1110_v30 = vld [vmem:[#allocation7 + $0x10] sm:$0xff] }
0x11a0   :  { %v1639_v29 = vpop.eup %1638 }
0x11a1   :  { %685 = vrot.lane.b32.xlu0 %v1639_v29, %s1791_s25  ;;  %v1486_v29 = vpack.c.bf16 %v1111_v27, %v1109_v26  ;;  %v1148_v26 = vld [vmem:[#allocation7 + $0x140] sm:$0xff]  ;;  %v1150_v27 = vld [vmem:[#allocation7 + $0x150] sm:$0xff] }
0x11a2   :  { %v1641_v31 = vpop.eup %1640 }
0x11a3   :  { %v679_v32 = vadd.f32 1.0, %v1641_v31  ;;  %v1113_v31 = vld [vmem:[#allocation7 + $0x28] sm:$0xff] }
0x11a5   :  { %1642 = vrcp.f32 %v679_v32  ;;  %v1115_v32 = vld [vmem:[#allocation7 + $0x38] sm:$0xff] }
0x11af   :  { %v1643_v33 = vpop.eup %1642 }
0x11b0   :  { %v683_v37 = vmul.f32 %v1643_v33, %v615_v17 }
0x1213   :  { %v686_v35 = vpop.permute.xlu0 %685 }
0x1214   :  { %v688_v36 = vmul.f32 %v1643_v33, %v686_v35  ;;  %v1490_v35 = vpack.c.bf16 %v1115_v32, %v1113_v31  ;;  %v1152_v32 = vld [vmem:[#allocation7 + $0x160] sm:$0xff] }
0x1216   :  { %690 = vrot.lane.b32.xlu1 %v688_v36, %s1792_s3  ;;  %v1112_v36 = vld [vmem:[#allocation7 + $0x20] sm:$0xff] }
0x1288   :  { %v691_v39 = vpop.permute.xlu1 %690 }
0x1289   :  { %v693_v40 = vadd.f32 %v691_v39, %v683_v37  ;;  %v1117_v37 = vld [vmem:[#allocation7 + $0x48] sm:$0xff] }
0x128b   :  { %1644 = vtanh.f32 %v693_v40 }
0x1295   :  { %v1645_v41 = vpop.eup %1644 }
0x1296   :  { %696 = vrot.lane.b32.xlu0 %v1645_v41, %s1791_s25  ;;  %v1116_v41 = vld [vmem:[#allocation7 + $0x40] sm:$0xff] }
0x1308   :  { %v697_v42 = vpop.permute.xlu0 %696 }
0x1309   :  { %v699_v43 = vmul.f32 %v1643_v33, %v697_v42  ;;  %v1488_v33 = vpack.c.bf16 %v1110_v30, %v1108_v28  ;;  %v1118_v42 = vld [vmem:[#allocation7 + $0x50] sm:$0xff]  ;;  %v1153_v28 = vld [vmem:[#allocation7 + $0x168] sm:$0xff]  ;;  %v1528_v30 = vpack.c.bf16 %v1150_v27, %v1148_v26 }
0x130a   :  { %v1157_v27 = vld [vmem:[#allocation7 + $0x188] sm:$0xff] }
0x130b   :  { %v706_v44 = vpack.c.bf16 %v699_v43, %v699_v43 }
0x130d   :  { %708 = vrot.lane.b32.xlu1 %v706_v44, %s1792_s3  ;;  %v1123_v44 = vld [vmem:[#allocation7 + $0x78] sm:$0xff] }
0x137f   :  { %v709_v45 = vpop.permute.xlu1 %708 }
0x1380   :  { %1475 = vmatmul.mubr.msk.bf16.vlgmr.msra.gmra.mrb[28].mxu1 %vm162_vm3, %v709_v45  ;;  %v1496_v45 = vpack.c.bf16 %v1118_v42, %v1116_v41 }
0x1381   :  { %995 = vmatprep.mubr.bf16.mxu1 %v1790_v8  ;;  %964 = vmatpush1.bf16.msra.mxu1 %v1573_v7  ;;  %v1139_v7 = vld [vmem:[#allocation7 + $0xf8] sm:$0xff] }
0x1382   :  { %965 = vmatprep.subr.bf16.mxu1 %v1581_v4  ;;  %v1514_v10 = vpack.c.bf16 %v1139_v7, %v1137_v6  ;;  %v1136_v4 = vld [vmem:[#allocation7 + $0xe0] sm:$0xff] }
0x1385   :  { %966 = vmatpush1.bf16.msra.mxu1 %v1579_v12  ;;  %v1141_v12 = vld [vmem:[#allocation7 + $0x108] sm:$0xff] }
0x1386   :  { %1478 = vmatprep.subr.bf16.mxu1 %v1788_v0 }
0x1453   :  { %v747_v47 = vpop.f32.mrb[28].mxu1 }
0x1454   :  { %v753_v48 = vadd.f32 %v747_v47, %v705_v46  ;;  %v1476_v49 = vpop.f32.mrb[29].mxu1  ;;  %v1120_v47 = vld [vmem:[#allocation7 + $0x60] sm:$0xff] }
0x1455   :  { %v750_v50 = vpop.f32.mrb[30].mxu1  ;;  %v1125_v49 = vld [vmem:[#allocation7 + $0x88] sm:$0xff] }
0x1456   :  { %1646 = vtanh.f32 %v753_v48  ;;  %v1477_v51 = vpop.f32.mrb[31].mxu1  ;;  %v1352_v53 = vmul.f32 -1.442695, %v753_v48  ;;  %v1122_v48 = vld [vmem:[#allocation7 + $0x70] sm:$0xff]  ;;  %v1127_v50 = vld [vmem:[#allocation7 + $0x98] sm:$0xff] }
0x1457   :  { %v1500_v51 = vpack.c.bf16 %v1122_v48, %v1120_v47 }
0x1458   :  { %1648 = vpow2.f32 %v1352_v53  ;;  %v1124_v53 = vld [vmem:[#allocation7 + $0x80] sm:$0xff] }
0x1460   :  { %v1647_v52 = vpop.eup %1646 }
0x1461   :  { %763 = vrot.lane.b32.xlu0 %v1647_v52, %s1791_s25  ;;  %v1502_v52 = vpack.c.bf16 %v1127_v50, %v1125_v49 }
0x1462   :  { %v1649_v54 = vpop.eup %1648 }
0x1463   :  { %v757_v56 = vadd.f32 1.0, %v1649_v54  ;;  %v1126_v54 = vld [vmem:[#allocation7 + $0x90] sm:$0xff] }
0x1465   :  { %1650 = vrcp.f32 %v757_v56  ;;  %v1129_v56 = vld [vmem:[#allocation7 + $0xa8] sm:$0xff] }
0x146f   :  { %v1651_v57 = vpop.eup %1650 }
0x1470   :  { %v761_v61 = vmul.f32 %v1651_v57, %v693_v40 }
0x14d3   :  { %v764_v58 = vpop.permute.xlu0 %763 }
0x14d4   :  { %v766_v59 = vmul.f32 %v1651_v57, %v764_v58  ;;  %v1504_v58 = vpack.c.bf16 %v1126_v54, %v1124_v53 }
0x14d6   :  { %768 = vrot.lane.b32.xlu1 %v766_v59, %s1792_s3 }
0x14da   :  { %232 = vrot.lane.b32.xlu1 %v1923_v34, %s1792_s3 }
0x14de   :  { %389 = vrot.lane.b32.xlu1 %v1953_v16, %s1792_s3 }
0x14e2   :  { %545 = vrot.lane.b32.xlu1 %v1983_v60, %s1792_s3 }
0x14e6   :  { %701 = vrot.lane.b32.xlu1 %v699_v43, %s1792_s3  ;;  %v1121_v43 = vld [vmem:[#allocation7 + $0x68] sm:$0xff] }
0x14e7   :  { %v1498_v46 = vpack.c.bf16 %v1123_v44, %v1121_v43 }
0x1548   :  { %v769_v62 = vpop.permute.xlu1 %768 }
0x1549   :  { %v2019_v63 = vadd.f32 %v769_v62, %v761_v61  ;;  %v1128_v61 = vld [vmem:[#allocation7 + $0xa0] sm:$0xff]  ;;  %v1130_v62 = vld [vmem:[#allocation7 + $0xb0] sm:$0xff] }
0x154b   :  { %1652 = vtanh.f32 %v2019_v63 }
0x154c   :  { %v233_v1 = vpop.permute.xlu1 %232 }
0x154d   :  { %236 = vst.msk [vmem:[#allocation3] sm:$0x3] %vm235_vm4, %v233_v1  ;;  %v1133_v1 = vld [vmem:[#allocation7 + $0xc8] sm:$0xff] }
0x1550   :  { %v390_v2 = vpop.permute.xlu1 %389 }
0x1551   :  { %392 = vst.msk [vmem:[#allocation3 + $0x4] sm:$0x3] %vm235_vm4, %v390_v2  ;;  %v1135_v2 = vld [vmem:[#allocation7 + $0xd8] sm:$0xff] }
0x1554   :  { %v546_v34 = vpop.permute.xlu1 %545 }
0x1555   :  { %v1653_v16 = vpop.eup %1652  ;;  %548 = vst.msk [vmem:[#allocation3 + $0x8] sm:$0x3] %vm235_vm4, %v546_v34  ;;  %v1508_v34 = vpack.c.bf16 %v1130_v62, %v1128_v61 }
0x1556   :  { %774 = vrot.lane.b32.xlu0 %v1653_v16, %s1791_s25  ;;  %v1510_v16 = vpack.c.bf16 %v1135_v2, %v1133_v1  ;;  %s1314_s25 = sshll.u32 %s1795_s2, 4  ;;  %s1315_s25 = int_to_ptr.vmem [resolvable:$true] %s1314_s25 }
0x1558   :  { %v702_v60 = vpop.permute.xlu1 %701 }
0x1559   :  { %704 = vst.msk [vmem:[#allocation3 + $0xc] sm:$0x3] %vm235_vm4, %v702_v60  ;;  %v1132_v60 = vld [vmem:[#allocation7 + $0xc0] sm:$0xff] }
0x155a   :  { %311 = vrot.lane.b32.xlu0 %v1938_v55, %s1792_s3  ;;  %v1584_v55 = vld [vmem:[#allocation4 + $0x14] ss:$28 sps:$4 sm:$0xff]   ;;  %v1512_v9 = vpack.c.bf16 %v1134_v3, %v1132_v60 }
0x155b   :  { %1006 = vmatprep.subr.bf16.mxu0 %v1584_v55  ;;  %v1143_v55 = vld [vmem:[#allocation7 + $0x118] sm:$0xff] }
0x155e   :  { %467 = vrot.lane.b32.xlu0 %v1968_v38, %s1792_s3 }
0x1562   :  { %623 = vrot.lane.b32.xlu0 %v1997_v20, %s1792_s3 }
0x15c8   :  { %v775_v38 = vpop.permute.xlu0 %774 }
0x15c9   :  { %v777_v13 = vmul.f32 %v1651_v57, %v775_v38  ;;  %v1131_v57 = vld [vmem:[#allocation7 + $0xb8] sm:$0xff]  ;;  %v1516_v38 = vpack.c.bf16 %v1138_v11, %v1136_v4 }
0x15ca   :  { %v1506_v59 = vpack.c.bf16 %v1131_v57, %v1129_v56 }
0x15cb   :  { %779 = vrot.lane.b32.xlu0 %v777_v13, %s1792_s3  ;;  %v1518_v13 = vpack.c.bf16 %v1143_v55, %v1141_v12  ;;  %s1730_s3 = scalar_lea.vmem %s1305_s0, 32 }
0x15cc   :  { %v312_v14 = vpop.permute.xlu0 %311  ;;  %p1731_p2 = scmp.ne.s32.totalorder %s1305_s0, %s1730_s3  ;;  %p1736_p4 = scmp.lt.s32.totalorder %s1730_s3, %s1730_s3 }
0x15cd   :  { %314 = vst.msk [vmem:[#allocation3 + $0x2] sm:$0x3] %vm235_vm4, %v312_v14  ;;  %v1140_v14 = vld [vmem:[#allocation7 + $0x100] sm:$0xff] }
0x15ce   :  { %p1737_p5 = por %p1736_p4, %p1735_p3 }
0x15d0   :  { %v468_v5 = vpop.permute.xlu0 %467  ;;  %p1738_p6 = pnand %p1737_p5, %p1731_p2 }
0x15d1   :  { %470 = vst.msk [vmem:[#allocation3 + $0x6] sm:$0x3] %vm235_vm4, %v468_v5  ;;  %v1142_v5 = vld [vmem:[#allocation7 + $0x110] sm:$0xff] }
0x15d4   :  { %v624_v15 = vpop.permute.xlu0 %623 }
0x15d5   :  { %626 = vst.msk [vmem:[#allocation3 + $0xa] sm:$0x3] %vm235_vm4, %v624_v15  ;;  %v1145_v15 = vld [vmem:[#allocation7 + $0x128] sm:$0xff] }
0x15d8   :  { %v789_v19 = vld [vmem:[#allocation3] sm:$0xff] }
0x163d   :  { %v780_v17 = vpop.permute.xlu0 %779 }
0x163e   :  { %782 = vst.msk [vmem:[#allocation3 + $0xe] sm:$0x3] %vm235_vm4, %v780_v17  ;;  %783 = vst.msk [vmem:[#allocation9] sm:$0x3] %vm235_vm4, %v780_v17  ;;  %v1147_v17 = vld [vmem:[#allocation7 + $0x138] sm:$0xff] }
0x1645   :  { %v790_v20 = vld [vmem:[#allocation3 + $0x8] sm:$0xff] }
0x1646   :  { %v791_v22 = vpack.c.bf16 %v790_v20, %v789_v19  ;;  %v1522_v19 = vpack.c.bf16 %v1147_v17, %v1145_v15  ;;  %v1144_v20 = vld [vmem:[#allocation7 + $0x120] sm:$0xff] }
0x1648   :  { %1367 = vmatmul.mubr.msk.bf16.vlgmr.msra.gmra.mrb[4].mxu0 %vm162_vm3, %v791_v22  ;;  %1368 = vmatmul.mubr.msk.bf16.vlgmr.msra.gmra.mrb[32].mxu1 %vm162_vm3, %v791_v22 }
0x1649   :  { %1007 = vmatpush1.bf16.msra.mxu0 %v1582_v18  ;;  %1479 = vmatpush3.bf16.msra.mxu1 %v1585_v21  ;;  %v1520_v18 = vpack.c.bf16 %v1142_v5, %v1140_v14  ;;  %v1146_v21 = vld [vmem:[#allocation7 + $0x130] sm:$0xff] }
0x164a   :  { %1008 = vmatprep.subr.bf16.mxu0 %v1588_v23  ;;  %1480 = vmatprep.subr.bf16.mxu1 %v1788_v0  ;;  %v1151_v23 = vld [vmem:[#allocation7 + $0x158] sm:$0xff] }
0x164b   :  { %1038 = vmatprep.mubr.bf16.mxu0 %v1790_v8  ;;  %1482 = vmatprep.mubr.msk.bf16.mxu1 %vm1789_vm0, %v1788_v0  ;;  %v1114_v8 = vld [vmem:[#allocation7 + $0x30] sm:$0xff]  ;;  %v1119_v0 = vld [vmem:[#allocation7 + $0x58] sm:$0xff] }
0x164c   :  { %v1492_v39 = vpack.c.bf16 %v1114_v8, %v1112_v36  ;;  %v1494_v40 = vpack.c.bf16 %v1119_v0, %v1117_v37  ;;  %v810_v36 = vlaneseq }
0x164d   :  { %1009 = vmatpush1.bf16.msra.mxu0 %v1586_v24  ;;  %1481 = vmatpush3.bf16.msra.mxu1 %v1589_v25  ;;  %v1524_v24 = vpack.c.bf16 %v1146_v21, %v1144_v20 }
0x164e   :  { %1487 = vmatprep.subr.bf16.mxu0 %v1486_v29  ;;  %v1155_v29 = vld [vmem:[#allocation7 + $0x178] sm:$0xff]  ;;  %v811_v8 = vshrl.u32 %v810_v36, 7 }
0x164f   :  { %v1530_v31 = vpack.c.bf16 %v1155_v29, %v1153_v28  ;;  %v1159_v28 = vld [vmem:[#allocation7 + $0x198] sm:$0xff] }
0x1650   :  { %1369 = vmatmul.mubr.msk.bf16.vlgmr.msra.gmra.mrb[8].mxu0 %vm162_vm3, %v791_v22  ;;  %1483 = vmatmul.mubr.msk.bf16.vlgmr.msra.gmra.mrb[36].mxu1 %vm162_vm3, %v791_v22  ;;  %v1149_v22 = vld [vmem:[#allocation7 + $0x148] sm:$0xff]  ;;  %v812_v37 = vsub.s32 0, %v811_v8  ;;  %v820_v0 = vsub.s32 2, %v811_v8  ;;  %v824_v41 = vsub.s32 3, %v811_v8  ;;  %v836_v53 = vsub.s32 6, %v811_v8 }
0x1651   :  { %1489 = vmatpush1.bf16.msra.mxu0 %v1488_v33  ;;  %v1526_v25 = vpack.c.bf16 %v1151_v23, %v1149_v22  ;;  %v1154_v33 = vld [vmem:[#allocation7 + $0x170] sm:$0xff]  ;;  %v1534_v29 = vpack.c.bf16 %v1159_v28, %v1157_v27 }
0x1652   :  { %1491 = vmatprep.subr.bf16.mxu0 %v1490_v35  ;;  %v1532_v35 = vpack.c.bf16 %v1154_v33, %v1152_v32 }
0x1655   :  { %1493 = vmatpush1.bf16.msra.mxu0 %v1492_v39  ;;  %v808_v39 = vld [vmem:[%s2150_s5] sm:$0xff] }
0x1656   :  { %1495 = vmatprep.subr.bf16.mxu0 %v1494_v40  ;;  %v816_v40 = vsub.s32 1, %v811_v8  ;;  %v813_v42 = vrot.slane %v808_v39, %v812_v37  ;;  %v821_v43 = vrot.slane %v808_v39, %v820_v0  ;;  %v837_v6 = vrot.slane %v808_v39, %v836_v53  ;;  %v1166_v53 = vld [vmem:[#allocation7 + $0x1d0] sm:$0xff] }
0x1658   :  { %v817_v44 = vrot.slane %v808_v39, %v816_v40  ;;  %v1162_v40 = vld [vmem:[#allocation7 + $0x1b0] sm:$0xff] }
0x1659   :  { %1497 = vmatpush1.bf16.msra.mxu0 %v1496_v45  ;;  %v825_v45 = vrot.slane %v808_v39, %v824_v41 }
0x165a   :  { %1499 = vmatprep.subr.bf16.mxu0 %v1498_v46 }
0x165d   :  { %1501 = vmatpush1.bf16.msra.mxu0 %v1500_v51 }
0x165e   :  { %1503 = vmatprep.subr.bf16.mxu0 %v1502_v52  ;;  %v828_v52 = vsub.s32 4, %v811_v8 }
0x1660   :  { %v829_v3 = vrot.slane %v808_v39, %v828_v52 }
0x1661   :  { %1505 = vmatpush1.bf16.msra.mxu0 %v1504_v58 }
0x1662   :  { %1507 = vmatprep.subr.bf16.mxu0 %v1506_v59  ;;  %v832_v59 = vsub.s32 5, %v811_v8  ;;  %v1163_v8 = vld [vmem:[#allocation7 + $0x1b8] sm:$0xff] }
0x1665   :  { %1509 = vmatpush1.bf16.msra.mxu0 %v1508_v34 }
0x1666   :  { %1511 = vmatprep.subr.bf16.mxu0 %v1510_v16 }
0x1669   :  { %1513 = vmatpush1.bf16.msra.mxu0 %v1512_v9  ;;  %v833_v9 = vrot.slane %v808_v39, %v832_v59  ;;  %v1160_v39 = vld [vmem:[#allocation7 + $0x1a0] sm:$0xff] }
0x166a   :  { %1515 = vmatprep.subr.bf16.mxu0 %v1514_v10 }
0x166d   :  { %1517 = vmatpush1.bf16.msra.mxu0 %v1516_v38 }
0x166e   :  { %1519 = vmatprep.subr.bf16.mxu0 %v1518_v13 }
0x1671   :  { %1521 = vmatpush1.bf16.msra.mxu0 %v1520_v18 }
0x1672   :  { %1523 = vmatprep.subr.bf16.mxu0 %v1522_v19 }
0x1675   :  { %1525 = vmatpush1.bf16.msra.mxu0 %v1524_v24 }
0x1676   :  { %1527 = vmatprep.subr.bf16.mxu0 %v1526_v25 }
0x1679   :  { %1529 = vmatpush1.bf16.msra.mxu0 %v1528_v30  ;;  %v1156_v30 = vld [vmem:[#allocation7 + $0x180] sm:$0xff] }
0x167a   :  { %1531 = vmatprep.subr.bf16.mxu0 %v1530_v31  ;;  %v1158_v31 = vld [vmem:[#allocation7 + $0x190] sm:$0xff] }
0x167b   :  { %v1536_v32 = vpack.c.bf16 %v1158_v31, %v1156_v30 }
0x167d   :  { %1533 = vmatpush1.bf16.msra.mxu0 %v1532_v35  ;;  %v1161_v35 = vld [vmem:[#allocation7 + $0x1a8] sm:$0xff] }
0x167e   :  { %1535 = vmatprep.subr.bf16.mxu0 %v1534_v29  ;;  %v1538_v0 = vpack.c.bf16 %v1163_v8, %v1161_v35 }
0x1681   :  { %1537 = vmatpush1.bf16.msra.mxu0 %v1536_v32 }
0x1682   :  { %1539 = vmatprep.subr.bf16.mxu0 %v1538_v0 }
0x171b   :  { %v954_v46 = vpop.f32.mrb[4].mxu0  ;;  %v997_v47 = vpop.f32.mrb[32].mxu1 }
0x171c   :  { %v2052_v48 = vadd.f32 %v954_v46, %v813_v42  ;;  %v998_v49 = vadd.f32 %v997_v47, %v821_v43  ;;  %v956_v50 = vpop.f32.mrb[5].mxu0  ;;  %v999_v51 = vpop.f32.mrb[33].mxu1  ;;  %v1165_v46 = vld [vmem:[#allocation7 + $0x1c8] sm:$0xff]  ;;  %v1167_v47 = vld [vmem:[#allocation7 + $0x1d8] sm:$0xff] }
0x171d   :  { %v2054_v54 = vadd.f32 %v956_v50, %v817_v44  ;;  %v1000_v56 = vadd.f32 %v999_v51, %v825_v45  ;;  %v958_v57 = vpop.f32.mrb[6].mxu0  ;;  %v1001_v58 = vpop.f32.mrb[34].mxu1  ;;  %v1542_v52 = vpack.c.bf16 %v1167_v47, %v1165_v46 }
0x171e   :  { %1261 = vst [vmem:[%s2152_s7 + $0x10] sm:$0xff] %v998_v49  ;;  %v2059_v61 = vadd.f32 %v958_v57, %v813_v42  ;;  %v1002_v62 = vadd.f32 %v1001_v58, %v821_v43  ;;  %v960_v1 = vpop.f32.mrb[7].mxu0  ;;  %v1003_v2 = vpop.f32.mrb[35].mxu1  ;;  %v1540_v43 = vpack.c.bf16 %v1162_v40, %v1160_v39  ;;  %v1164_v49 = vld [vmem:[#allocation7 + $0x1c0] sm:$0xff]  ;;  %v1171_v57 = vld [vmem:[#allocation7 + $0x1f8] sm:$0xff] }
0x171f   :  { %1262 = vst [vmem:[%s2152_s7 + $0x18] sm:$0xff] %v1000_v56  ;;  %v2064_v34 = vadd.f32 %v960_v1, %v817_v44  ;;  %v1004_v16 = vadd.f32 %v1003_v2, %v825_v45  ;;  %v1090_v60 = vmax.f32 %v2052_v48, %v2054_v54  ;;  %v1169_v56 = vld [vmem:[#allocation7 + $0x1e8] sm:$0xff]  ;;  %v1544_v58 = vpack.c.bf16 %v1166_v53, %v1164_v49  ;;  %v1170_v1 = vld [vmem:[#allocation7 + $0x1f0] sm:$0xff] }
0x1720   :  { %1263 = vst [vmem:[%s2152_s7 + $0x48] sm:$0xff] %v1002_v62  ;;  %1541 = vmatpush1.bf16.msra.mxu0 %v1540_v43  ;;  %v1546_v59 = vpack.c.bf16 %v1171_v57, %v1169_v56  ;;  %v1168_v62 = vld [vmem:[#allocation7 + $0x1e0] sm:$0xff]  ;;  %v1278_v2 = vand.u32 127, %v810_v36 }
0x1721   :  { %1264 = vst [vmem:[%s2152_s7 + $0x50] sm:$0xff] %v1004_v16  ;;  %1091 = vmax.xlane.f32.xlu1 %v1090_v60  ;;  %v1093_v7 = vmax.f32 %v2059_v61, %v2064_v34  ;;  %1543 = vmatprep.subr.bf16.mxu0 %v1542_v52  ;;  %v1548_v16 = vpack.c.bf16 %v1170_v1, %v1168_v62 }
0x1722   :  { %vm1279_vm5 = vcmp.eq.s32.totalorder %v1278_v2, 1 }
0x1723   :  { %v1040_v10 = vpop.f32.mrb[8].mxu0  ;;  %1094 = vmax.xlane.f32.xlu0 %v1093_v7  ;;  %v1083_v4 = vpop.f32.mrb[36].mxu1 }
0x1724   :  { %v1041_v11 = vadd.f32 %v1040_v10, %v829_v3  ;;  %v2076_v12 = vadd.f32 %v1083_v4, %v837_v6  ;;  %v1042_v55 = vpop.f32.mrb[9].mxu0  ;;  %v1484_v38 = vpop.f32.mrb[37].mxu1  ;;  %1545 = vmatpush1.bf16.msra.mxu0 %v1544_v58 }
0x1725   :  { %v1043_v13 = vadd.f32 %v1042_v55, %v833_v9  ;;  %v1044_v14 = vpop.f32.mrb[10].mxu0  ;;  %v1086_v5 = vpop.f32.mrb[38].mxu1  ;;  %1547 = vmatprep.subr.bf16.mxu0 %v1546_v59 }
0x1726   :  { %v1265_v15 = vmul.f32 1.442695, %v1041_v11  ;;  %v1371_v17 = vmul.f32 -1.442695, %v2076_v12  ;;  %v1045_v18 = vadd.f32 %v1044_v14, %v829_v3  ;;  %v2079_v19 = vadd.f32 %v1086_v5, %v837_v6  ;;  %v1046_v20 = vpop.f32.mrb[11].mxu0  ;;  %v1485_v21 = vpop.f32.mrb[39].mxu1 }
0x1727   :  { %v1267_v22 = vmul.f32 1.442695, %v1043_v13  ;;  %v1047_v23 = vadd.f32 %v1046_v20, %v833_v9 }
0x1728   :  { %1654 = vpow2.f32 %v1265_v15  ;;  %v1269_v24 = vmul.f32 1.442695, %v1045_v18  ;;  %v1372_v25 = vmul.f32 -1.442695, %v2079_v19  ;;  %1549 = vmatpush1.bf16.msra.mxu0 %v1548_v16 }
0x1729   :  { %1656 = vpow2.f32 %v1371_v17  ;;  %v1271_v26 = vmul.f32 1.442695, %v1047_v23 }
0x172a   :  { %1658 = vpow2.f32 %v1267_v22 }
0x172b   :  { %1660 = vpow2.f32 %v1269_v24 }
0x172c   :  { %1662 = vpow2.f32 %v1372_v25 }
0x172d   :  { %1664 = vpow2.f32 %v1271_v26 }
0x1732   :  { %v1655_v33 = vpop.eup %1654 }
0x1733   :  { %v1657_v37 = vpop.eup %1656  ;;  %1273 = vst [vmem:[%s2152_s7 + $0x20] sm:$0xff] %v1655_v33 }
0x1734   :  { %v1659_v41 = vpop.eup %1658  ;;  %v1286_v42 = vadd.f32 1.0, %v1657_v37 }
0x1735   :  { %v1661_v44 = vpop.eup %1660  ;;  %1274 = vst [vmem:[%s2152_s7 + $0x28] sm:$0xff] %v1659_v41 }
0x1736   :  { %v1663_v45 = vpop.eup %1662  ;;  %1666 = vrcp.f32 %v1286_v42  ;;  %1275 = vst [vmem:[%s2152_s7 + $0x58] sm:$0xff] %v1661_v44 }
0x1737   :  { %v1665_v50 = vpop.eup %1664  ;;  %v1287_v51 = vadd.f32 1.0, %v1663_v45 }
0x1738   :  { %1276 = vst [vmem:[%s2152_s7 + $0x60] sm:$0xff] %v1665_v50 }
0x1739   :  { %1668 = vrcp.f32 %v1287_v51  ;;  %785 = vrot.lane.b32.xlu0 %v2019_v63, %s1793_s20 }
0x1740   :  { %v1667_v60 = vpop.eup %1666 }
0x1741   :  { %v1292_v3 = vsel %vm1279_vm5, %v1667_v60, %v2076_v12 }
0x1742   :  { %1294 = vst [vmem:[%s2152_s7 + $0x30] sm:$0xff] %v1292_v3 }
0x1743   :  { %v1669_v6 = vpop.eup %1668 }
0x1744   :  { %v1293_v7 = vsel %vm1279_vm5, %v1669_v6, %v2079_v19 }
0x1745   :  { %1295 = vst [vmem:[%s2152_s7 + $0x68] sm:$0xff] %v1293_v7 }
0x17ae   :  { %v1092_v63 = vpop.xlane.xlu1 %1091 }
0x17af   :  { %v1096_v36 = vsub.f32 %v2052_v48, %v1092_v63  ;;  %v1097_v9 = vsub.f32 %v2054_v54, %v1092_v63 }
0x17b0   :  { %v1095_v10 = vpop.xlane.xlu0 %1094 }
0x17b1   :  { %v1100_v4 = vmul.f32 1.442695, %v1096_v36  ;;  %v1102_v11 = vmul.f32 1.442695, %v1097_v9  ;;  %v1098_v12 = vsub.f32 %v2059_v61, %v1095_v10  ;;  %v1099_v55 = vsub.f32 %v2064_v34, %v1095_v10 }
0x17b3   :  { %1670 = vpow2.f32 %v1100_v4  ;;  %v1106_v38 = vmul.f32 1.442695, %v1099_v55  ;;  %v1104_v14 = vmul.f32 1.442695, %v1098_v12 }
0x17b4   :  { %1672 = vpow2.f32 %v1102_v11  ;;  %v786_v13 = vpop.permute.xlu0 %785 }
0x17b5   :  { %788 = vst.msk [vmem:[#allocation10] sm:$0x3] %vm235_vm4, %v786_v13  ;;  %1674 = vpow2.f32 %v1106_v38 }
0x17b6   :  { %1676 = vpow2.f32 %v1104_v14 }
0x17bd   :  { %v1671_v5 = vpop.eup %1670 }
0x17be   :  { %v1673_v48 = vpop.eup %1672 }
0x17bf   :  { %1236 = vmatprep.mubr.f32.mxu0 %v1673_v48  ;;  %v1675_v54 = vpop.eup %1674 }
0x17c0   :  { %1237 = vmatmul.mubr.f32.vlgmr.msra.gmra.mrb[12].mxu0 %v1671_v5  ;;  %v1677_v15 = vpop.eup %1676 }
0x17c1   :  { %1242 = vmatprep.mubr.f32.mxu0 %v1675_v54 }
0x17c4   :  { %1243 = vmatmul.mubr.f32.gmra.mrb[14].mxu0 %v1677_v15 }
0x17c5   :  { %1741 = shalt.err (!%p1738_p6)
}
0x17c6   :  { %s1742_s5 = scalar_lea.hbm %s2153_s8, 32 }
0x17c7   :  { %p1743_p7 = scmp.ne.s32.totalorder %s2153_s8, %s1742_s5  ;;  %p1746_p8 = scmp.lt.u32.totalorder %s1742_s5, %s2153_s8 }
0x17c9   :  { %p1748_p9 = pnand %p1746_p8, %p1743_p7 }
0x17cb   :  { %1751 = shalt.err (!%p1748_p9)
}
0x17cc   :  { %1307 = dma.vmem_to_hbm [thread:$0]  %s1305_s0, 32, %s2153_s8, [#allocation6]  }
0x17cd   :  { %s1752_s10 = scalar_lea.vmem %s1315_s25, 32  ;;  %p1757_p11 = scmp.lt.s32.totalorder %s1315_s25, %s1315_s25 }
0x17ce   :  { %p1753_p10 = scmp.ne.s32.totalorder %s1315_s25, %s1752_s10  ;;  %p1758_p12 = scmp.lt.s32.totalorder %s1752_s10, %s1752_s10 }
0x17d0   :  { %p1759_p13 = por %p1758_p12, %p1757_p11 }
0x17d2   :  { %p1760_p0 = pnand %p1759_p13, %p1753_p10 }
0x17d4   :  { %1763 = shalt.err (!%p1760_p0)
}
0x17d5   :  { %s1764_s15 = scalar_lea.hbm %s2154_s9, 32 }
0x17d6   :  { %p1765_p1 = scmp.ne.s32.totalorder %s2154_s9, %s1764_s15  ;;  %p1768_p2 = scmp.lt.u32.totalorder %s1764_s15, %s2154_s9 }
0x17d8   :  { %p1770_p3 = pnand %p1768_p2, %p1765_p1 }
0x17da   :  { %1773 = shalt.err (!%p1770_p3)
}
0x17db   :  { %1317 = dma.vmem_to_hbm [thread:$0]  %s1315_s25, 32, %s2154_s9, [#allocation11]  }
0x1893   :  { %v1238_v61 = vpop.f32.mrb[12].mxu0 }
0x1894   :  { %1678 = vrcp.f32 %v1238_v61  ;;  %v1240_v34 = vpop.f32.mrb[13].mxu0 }
0x1895   :  { %1680 = vrcp.f32 %v1240_v34 }
0x1897   :  { %v1244_v17 = vpop.f32.mrb[14].mxu0 }
0x1898   :  { %1682 = vrcp.f32 %v1244_v17  ;;  %v1246_v18 = vpop.f32.mrb[15].mxu0 }
0x1899   :  { %1684 = vrcp.f32 %v1246_v18 }
0x189e   :  { %v1679_v19 = vpop.eup %1678 }
0x189f   :  { %v1681_v20 = vpop.eup %1680  ;;  %v1253_v21 = vmul.f32 %v1679_v19, %v1671_v5 }
0x18a0   :  { %v1254_v22 = vmul.f32 %v1681_v20, %v1673_v48 }
0x18a1   :  { %1257 = vst [vmem:[%s2152_s7] sm:$0xff] %v1253_v21 }
0x18a2   :  { %v1683_v23 = vpop.eup %1682  ;;  %1258 = vst [vmem:[%s2152_s7 + $0x8] sm:$0xff] %v1254_v22 }
0x18a3   :  { %v1685_v24 = vpop.eup %1684  ;;  %v1255_v25 = vmul.f32 %v1683_v23, %v1677_v15 }
0x18a4   :  { %v1256_v26 = vmul.f32 %v1685_v24, %v1675_v54 }
0x18a5   :  { %1259 = vst [vmem:[%s2152_s7 + $0x38] sm:$0xff] %v1255_v25 }
0x18a6   :  { %1260 = vst [vmem:[%s2152_s7 + $0x40] sm:$0xff] %v1256_v26 }
0x18a7   :  { %1778 = dma.done.wait [#allocation6], 32  }
0x18a8   :  { %1779 = vsyncadd [#allocation6], 4294967264 }
0x18a9   :  { %1780 = dma.done.wait [#allocation11], 32  }
0x18aa   :  { %1781 = vsyncadd [#allocation11], 4294967264 }
0x18ab   :  { %1326 = vsyncpa [#allocation5], 1 }
0x18ac   :  { %1327 = vsyncpa [#allocation8], 1 }
0x18ad   :  { %1328 = vsyncpa [#allocation6], 1 }
0x18ae   :  { %1329 = vsyncpa [#allocation11], 1 }

</bundles_post_ra>
